<compile_context>
chip_gen: v7x
topology: tpu7x:2x2x1
jax: 0.10.0
libtpu: 0.0.40
codegen_flags: <defaults>
</compile_context>

<pallas_src>
import functools

import jax
import jax.numpy as jnp
from jax.experimental import pallas as pl
from jax.experimental.pallas import tpu as pltpu


def attention_kernel(xf_ref, xq_ref, wqkv_ref, wout_ref, bout_ref, o_ref,
                     acc_ref, *, dim_head):
    """Grid = (batch, q_tiles, heads); heads is the (innermost) reduction axis.

    xf_ref   : (1, C, N)              full spatial extent (source of K/V)
    xq_ref   : (1, C, Tq)             query tile of the same input
    wqkv_ref : (1, 3*dh, C)  bf16     per-head [scale*Wq; Wk; Wv]
    wout_ref : (1, dim_out, dh) bf16  per-head slice of the output projection
    bout_ref : (dim_out, 1)  f32      output bias (broadcast over lanes)
    o_ref    : (1, dim_out, Tq)       output tile (channel-first == NCHW)
    acc_ref  : (dim_out, Tq) f32      output-projection accumulator (scratch)
    """
    h = pl.program_id(2)

    @pl.when(h == 0)
    def _init():
        acc_ref[...] = jnp.zeros_like(acc_ref)

    wqkv = wqkv_ref[0]                       # (3*dh, C), bf16, q rows pre-scaled
    w_q = wqkv[:dim_head]                    # (dh, C)
    w_kv = wqkv[dim_head:]                   # (2*dh, C)

    x_full = xf_ref[0].astype(jnp.bfloat16)  # (C, N)
    x_q = xq_ref[0].astype(jnp.bfloat16)     # (C, Tq)

    # 1x1-conv projections as (out_ch, C) @ (C, spatial) matmuls.
    kv = jax.lax.dot_general(w_kv, x_full, (((1,), (0,)), ((), ())),
                             preferred_element_type=jnp.float32)     # (2*dh, N)
    q = jax.lax.dot_general(w_q, x_q, (((1,), (0,)), ((), ())),
                            preferred_element_type=jnp.float32)      # (dh, Tq)

    k = kv[:dim_head].astype(jnp.bfloat16)   # (dh, N)
    v = kv[dim_head:].astype(jnp.bfloat16)   # (dh, N)

    # sim[i, j] = sum_d q[d, i] * k[d, j]   (scale already folded into w_q)
    sim = jax.lax.dot_general(q.astype(jnp.bfloat16), k,
                              (((0,), (0,)), ((), ())),
                              preferred_element_type=jnp.float32)    # (Tq, N)

    # numerically-stable softmax over j (f32 vector math)
    sim = sim - jnp.max(sim, axis=-1, keepdims=True)
    p = jnp.exp(sim)
    attn = p * pl.reciprocal(jnp.sum(p, axis=-1, keepdims=True), approx=True)

    # out_h[d, i] = sum_j v[d, j] * attn[i, j]
    out_h = jax.lax.dot_general(v, attn.astype(jnp.bfloat16),
                                (((1,), (1,)), ((), ())),
                                preferred_element_type=jnp.float32)  # (dh, Tq)

    # accumulate this head's contribution to the output projection
    acc_ref[...] += jax.lax.dot_general(wout_ref[0], out_h.astype(jnp.bfloat16),
                                        (((1,), (0,)), ((), ())),
                                        preferred_element_type=jnp.float32)

    @pl.when(h == pl.num_programs(2) - 1)
    def _finalize():
        o_ref[0] = (acc_ref[...] + bout_ref[...]).astype(o_ref.dtype)


def _pick_q_tile(n):
    for t in (512, 256, 128):
        if n % t == 0:
            return t
    return n


def _vmem_limit_bytes(n, tq, c, dim_head, dim_out):
    est = (
        4 * tq * n * 2                 # sim / p (f32)
        + 2 * tq * n * 2               # bf16 copies of attention operands
        + 4 * (3 * dim_head) * n * 2   # qkv projections
        + 4 * c * (n + tq) * 4         # x blocks (double-buffered)
        + 4 * dim_out * tq * 6         # accumulator + output blocks
        + (2 << 20)                    # weights / pipeline headroom
    )
    return int(max(32 << 20, min(est, 56 << 20)))


def attention_forward(x_nchw, w_qkv, w_out, b_out, heads, dim_head):
    """x_nchw: (B, C, H, W); w_qkv: (3*hidden, C, 1, 1); w_out: (dim_out, hidden, 1, 1)."""
    b, c, H, W = x_nchw.shape
    n = H * W
    hidden = heads * dim_head
    dim_out = w_out.shape[0]
    scale = float(dim_head) ** -0.5

    # Channels-on-sublane / spatial-on-lane: NCHW -> (B, C, N), no transpose.
    x_bcn = x_nchw.reshape(b, c, n)

    # Per-head weight slabs; q rows pre-scaled so the kernel skips `q * scale`.
    wq, wk, wv = jnp.split(w_qkv.reshape(3 * hidden, c), 3, axis=0)
    per_head = lambda w: w.reshape(heads, dim_head, c)
    wqkv_heads = jnp.concatenate(
        [per_head(wq) * scale, per_head(wk), per_head(wv)],
        axis=1).astype(jnp.bfloat16)                                 # (heads, 3*dh, C)
    wout_heads = jnp.transpose(
        w_out.reshape(dim_out, heads, dim_head), (1, 0, 2)
    ).astype(jnp.bfloat16)                                           # (heads, dim_out, dh)
    bout = b_out.reshape(dim_out, 1).astype(jnp.float32)

    tq = _pick_q_tile(n)
    n_q_tiles = n // tq

    kernel = functools.partial(attention_kernel, dim_head=dim_head)

    out_bcn = pl.pallas_call(
        kernel,
        out_shape=jax.ShapeDtypeStruct((b, dim_out, n), x_nchw.dtype),
        grid=(b, n_q_tiles, heads),
        in_specs=[
            pl.BlockSpec((1, c, n), lambda i, qi, h: (i, 0, 0)),          # K/V source
            pl.BlockSpec((1, c, tq), lambda i, qi, h: (i, 0, qi)),        # query tile
            pl.BlockSpec((1, 3 * dim_head, c), lambda i, qi, h: (h, 0, 0)),
            pl.BlockSpec((1, dim_out, dim_head), lambda i, qi, h: (h, 0, 0)),
            pl.BlockSpec((dim_out, 1), lambda i, qi, h: (0, 0)),
        ],
        out_specs=pl.BlockSpec((1, dim_out, tq), lambda i, qi, h: (i, 0, qi)),
        scratch_shapes=[pltpu.VMEM((dim_out, tq), jnp.float32)],
        compiler_params=pltpu.CompilerParams(
            dimension_semantics=("parallel", "parallel", "arbitrary"),
            vmem_limit_bytes=_vmem_limit_bytes(n, tq, c, dim_head, dim_out),
        ),
    )(x_bcn, x_bcn, wqkv_heads, wout_heads, bout)

    # (B, dim_out, N) is already channel-first: just reshape, no transpose.
    return out_bcn.reshape(b, dim_out, H, W)


def attention_ref(x, w_qkv, w_out, b_out, heads, dim_head):
    """Pure-JAX reference mirroring the PyTorch forward, for verification."""
    b, c, H, W = x.shape
    n = H * W
    hidden = heads * dim_head
    scale = float(dim_head) ** -0.5

    xf = x.reshape(b, c, n)
    qkv = jnp.einsum('oc,bcn->bon', w_qkv.reshape(3 * hidden, c), xf)
    q, k, v = jnp.split(qkv, 3, axis=1)
    re = lambda t: t.reshape(b, heads, dim_head, n)
    q, k, v = re(q) * scale, re(k), re(v)
    sim = jnp.einsum('bhdi,bhdj->bhij', q, k)
    attn = jax.nn.softmax(sim, axis=-1)
    out = jnp.einsum('bhij,bhdj->bhid', attn, v)                  # (b, h, n, d)
    out = jnp.transpose(out, (0, 1, 3, 2)).reshape(b, hidden, n)  # b (h d) n
    dim_out = w_out.shape[0]
    o = jnp.einsum('oc,bcn->bon', w_out.reshape(dim_out, hidden), out)
    o = o + b_out[None, :, None]
    return o.reshape(b, dim_out, H, W)


if __name__ == "__main__":
    heads, dim_head = 4, 32
    dim, dim_out = 8, 8
    hidden = heads * dim_head

    key = jax.random.PRNGKey(0)
    k1, k2, k3, k4 = jax.random.split(key, 4)
    w_qkv = jax.random.normal(k2, (3 * hidden, dim, 1, 1), jnp.float32) * (dim ** -0.5)
    w_out = jax.random.normal(k3, (dim_out, hidden, 1, 1), jnp.float32) * (hidden ** -0.5)
    b_out = jax.random.normal(k4, (dim_out,), jnp.float32) * 0.01

    # Case 1: single query tile (N = 256)
    x1 = jax.random.normal(k1, (2, dim, 16, 16), jnp.float32)
    out1 = jax.block_until_ready(
        attention_forward(x1, w_qkv, w_out, b_out, heads, dim_head))
    ref1 = attention_ref(x1, w_qkv, w_out, b_out, heads, dim_head)
    assert out1.shape == ref1.shape, (out1.shape, ref1.shape)
    assert jnp.allclose(out1, ref1, atol=3e-2, rtol=3e-2), "mismatch vs reference (N=256)"

    # Case 2: multiple query tiles (N = 1024 -> 2 tiles of 512)
    x2 = jax.random.normal(k1, (1, dim, 32, 32), jnp.float32)
    out2 = jax.block_until_ready(
        attention_forward(x2, w_qkv, w_out, b_out, heads, dim_head))
    ref2 = attention_ref(x2, w_qkv, w_out, b_out, heads, dim_head)
    assert jnp.allclose(out2, ref2, atol=3e-2, rtol=3e-2), "mismatch vs reference (N=1024)"

    print("KERNEL_OK")
</pallas_src>

<mosaic_0001>
module attributes {stable_mosaic.version = 11 : i64} {
  func.func @attention_kernel(%arg0: i32, %arg1: i32, %arg2: i32, %arg3: memref<1x8x256xf32, #tpu.memory_space<vmem>>, %arg4: memref<1x8x256xf32, #tpu.memory_space<vmem>>, %arg5: memref<1x96x8xbf16, #tpu.memory_space<vmem>>, %arg6: memref<1x8x32xbf16, #tpu.memory_space<vmem>>, %arg7: memref<8x1xf32, #tpu.memory_space<vmem>>, %arg8: memref<1x8x256xf32, #tpu.memory_space<vmem>>, %arg9: memref<8x256xf32, #tpu.memory_space<vmem>>) attributes {dimension_semantics = [#tpu.dimension_semantics<parallel>, #tpu.dimension_semantics<parallel>, #tpu.dimension_semantics<arbitrary>], iteration_bounds = array<i64: 2, 1, 4>, scalar_prefetch = 0 : i64, scratch_operands = 1 : i64, tpu.core_type = #tpu.core_type<tc>, window_params = [{transform_indices = @transform_0, window_bounds = array<i64: 1, 8, 256>}, {transform_indices = @transform_1, window_bounds = array<i64: 1, 8, 256>}, {transform_indices = @transform_2, window_bounds = array<i64: 1, 96, 8>}, {transform_indices = @transform_3, window_bounds = array<i64: 1, 8, 32>}, {pipeline_mode = #tpu.pipeline_mode<synchronous>, transform_indices = @transform_4, window_bounds = array<i64: 8, 1>}, {transform_indices = @transform_5, window_bounds = array<i64: 1, 8, 256>}]} {
    %c0_i32 = arith.constant 0 : i32
    %0 = arith.cmpi eq, %arg2, %c0_i32 : i32
    %1 = arith.extui %0 : i1 to i32
    %c0_i32_0 = arith.constant 0 : i32
    %2 = arith.cmpi ne, %1, %c0_i32_0 : i32
    scf.if %2 {
      %cst_23 = arith.constant 0.000000e+00 : f32
      %43 = vector.broadcast %cst_23 : f32 to vector<8x256xf32>
      %c0_24 = arith.constant 0 : index
      %c0_25 = arith.constant 0 : index
      %44 = vector.load %arg9[%c0_24, %c0_25] : memref<8x256xf32, #tpu.memory_space<vmem>>, vector<8x256xf32>
      tpu.vector_store %arg9[%c0_24, %c0_25], %43 {strides = array<i32>} : memref<8x256xf32, #tpu.memory_space<vmem>>, vector<8x256xf32>,
    } else {
    }
    %c0 = arith.constant 0 : index
    %c0_1 = arith.constant 0 : index
    %c0_2 = arith.constant 0 : index
    %3 = vector.load %arg5[%c0, %c0_1, %c0_2] : memref<1x96x8xbf16, #tpu.memory_space<vmem>>, vector<1x96x8xbf16>
    %4 = vector.shape_cast %3 : vector<1x96x8xbf16> to vector<96x8xbf16>
    %5 = vector.extract_strided_slice %4 {offsets = [0, 0], sizes = [32, 8], strides = [1, 1]} : vector<96x8xbf16> to vector<32x8xbf16>
    %6 = vector.extract_strided_slice %4 {offsets = [32, 0], sizes = [64, 8], strides = [1, 1]} : vector<96x8xbf16> to vector<64x8xbf16>
    %c0_3 = arith.constant 0 : index
    %c0_4 = arith.constant 0 : index
    %c0_5 = arith.constant 0 : index
    %7 = vector.load %arg3[%c0_3, %c0_4, %c0_5] : memref<1x8x256xf32, #tpu.memory_space<vmem>>, vector<1x8x256xf32>
    %8 = vector.shape_cast %7 : vector<1x8x256xf32> to vector<8x256xf32>
    %9 = arith.truncf %8 : vector<8x256xf32> to vector<8x256xbf16>
    %c0_6 = arith.constant 0 : index
    %c0_7 = arith.constant 0 : index
    %c0_8 = arith.constant 0 : index
    %10 = vector.load %arg4[%c0_6, %c0_7, %c0_8] : memref<1x8x256xf32, #tpu.memory_space<vmem>>, vector<1x8x256xf32>
    %11 = vector.shape_cast %10 : vector<1x8x256xf32> to vector<8x256xf32>
    %12 = arith.truncf %11 : vector<8x256xf32> to vector<8x256xbf16>
    %cst = arith.constant dense<0.000000e+00> : vector<64x256xf32>
    %13 = tpu.matmul %6, %9, %cst {dimension_numbers = #tpu.dot_dimension_numbers<[1], [0], [0], [1], [0, 0, 1, 1], [], []>} : vector<64x8xbf16>, vector<8x256xbf16>, vector<64x256xf32> -> vector<64x256xf32>
    %cst_9 = arith.constant dense<0.000000e+00> : vector<32x256xf32>
    %14 = tpu.matmul %5, %12, %cst_9 {dimension_numbers = #tpu.dot_dimension_numbers<[1], [0], [0], [1], [0, 0, 1, 1], [], []>} : vector<32x8xbf16>, vector<8x256xbf16>, vector<32x256xf32> -> vector<32x256xf32>
    %15 = vector.extract_strided_slice %13 {offsets = [0, 0], sizes = [32, 256], strides = [1, 1]} : vector<64x256xf32> to vector<32x256xf32>
    %16 = arith.truncf %15 : vector<32x256xf32> to vector<32x256xbf16>
    %17 = vector.extract_strided_slice %13 {offsets = [32, 0], sizes = [32, 256], strides = [1, 1]} : vector<64x256xf32> to vector<32x256xf32>
    %18 = arith.truncf %17 : vector<32x256xf32> to vector<32x256xbf16>
    %19 = arith.truncf %14 : vector<32x256xf32> to vector<32x256xbf16>
    %cst_10 = arith.constant dense<0.000000e+00> : vector<256x256xf32>
    %20 = tpu.matmul %19, %16, %cst_10 {dimension_numbers = #tpu.dot_dimension_numbers<[0], [0], [1], [1], [0, 1, 1, 1], [], []>} : vector<32x256xbf16>, vector<32x256xbf16>, vector<256x256xf32> -> vector<256x256xf32>
    %cst_11 = arith.constant dense<0xFF800000> : vector<256xf32>
    %21 = vector.multi_reduction <maximumf>, %20, %cst_11 [1] : vector<256x256xf32> to vector<256xf32>
    %22 = vector.shape_cast %21 : vector<256xf32> to vector<256x1xf32>
    %23 = vector.broadcast %22 : vector<256x1xf32> to vector<256x256xf32>
    %24 = arith.subf %20, %23 : vector<256x256xf32>
    %25 = math.exp %24 : vector<256x256xf32>
    %cst_12 = arith.constant dense<0.000000e+00> : vector<256xf32>
    %26 = vector.multi_reduction <add>, %25, %cst_12 [1] : vector<256x256xf32> to vector<256xf32>
    %27 = vector.shape_cast %26 : vector<256xf32> to vector<256x1xf32>
    %28 = tpu.reciprocal %27 {approx = true} : vector<256x1xf32> -> vector<256x1xf32>
    %29 = vector.broadcast %28 : vector<256x1xf32> to vector<256x256xf32>
    %30 = arith.mulf %25, %29 : vector<256x256xf32>
    %31 = arith.truncf %30 : vector<256x256xf32> to vector<256x256xbf16>
    %cst_13 = arith.constant dense<0.000000e+00> : vector<32x256xf32>
    %32 = tpu.matmul %18, %31, %cst_13 {dimension_numbers = #tpu.dot_dimension_numbers<[1], [1], [0], [0], [0, 0, 1, 0], [], []>} : vector<32x256xbf16>, vector<256x256xbf16>, vector<32x256xf32> -> vector<32x256xf32>
    %c0_14 = arith.constant 0 : index
    %c0_15 = arith.constant 0 : index
    %33 = vector.load %arg9[%c0_14, %c0_15] : memref<8x256xf32, #tpu.memory_space<vmem>>, vector<8x256xf32>
    %c0_16 = arith.constant 0 : index
    %c0_17 = arith.constant 0 : index
    %c0_18 = arith.constant 0 : index
    %34 = vector.load %arg6[%c0_16, %c0_17, %c0_18] : memref<1x8x32xbf16, #tpu.memory_space<vmem>>, vector<1x8x32xbf16>
    %35 = vector.shape_cast %34 : vector<1x8x32xbf16> to vector<8x32xbf16>
    %36 = arith.truncf %32 : vector<32x256xf32> to vector<32x256xbf16>
    %cst_19 = arith.constant dense<0.000000e+00> : vector<8x256xf32>
    %37 = tpu.matmul %35, %36, %cst_19 {dimension_numbers = #tpu.dot_dimension_numbers<[1], [0], [0], [1], [0, 0, 1, 1], [], []>} : vector<8x32xbf16>, vector<32x256xbf16>, vector<8x256xf32> -> vector<8x256xf32>
    %38 = arith.addf %33, %37 : vector<8x256xf32>
    %c0_20 = arith.constant 0 : index
    %c0_21 = arith.constant 0 : index
    %39 = vector.load %arg9[%c0_20, %c0_21] : memref<8x256xf32, #tpu.memory_space<vmem>>, vector<8x256xf32>
    tpu.vector_store %arg9[%c0_20, %c0_21], %38 {strides = array<i32>} : memref<8x256xf32, #tpu.memory_space<vmem>>, vector<8x256xf32>,
    %c3_i32 = arith.constant 3 : i32
    %40 = arith.cmpi eq, %arg2, %c3_i32 : i32
    %41 = arith.extui %40 : i1 to i32
    %c0_i32_22 = arith.constant 0 : i32
    %42 = arith.cmpi ne, %41, %c0_i32_22 : i32
    scf.if %42 {
      %c0_23 = arith.constant 0 : index
      %c0_24 = arith.constant 0 : index
      %43 = vector.load %arg9[%c0_23, %c0_24] : memref<8x256xf32, #tpu.memory_space<vmem>>, vector<8x256xf32>
      %c0_25 = arith.constant 0 : index
      %c0_26 = arith.constant 0 : index
      %44 = vector.load %arg7[%c0_25, %c0_26] : memref<8x1xf32, #tpu.memory_space<vmem>>, vector<8x1xf32>
      %45 = vector.broadcast %44 : vector<8x1xf32> to vector<8x256xf32>
      %46 = arith.addf %43, %45 : vector<8x256xf32>
      %c0_27 = arith.constant 0 : index
      %c0_28 = arith.constant 0 : index
      %c0_29 = arith.constant 0 : index
      %47 = vector.load %arg8[%c0_27, %c0_28, %c0_29] : memref<1x8x256xf32, #tpu.memory_space<vmem>>, vector<1x8x256xf32>
      %48 = vector.shape_cast %47 : vector<1x8x256xf32> to vector<8x256xf32>
      %49 = vector.shape_cast %46 : vector<8x256xf32> to vector<1x8x256xf32>
      tpu.vector_store %arg8[%c0_27, %c0_28, %c0_29], %49 {strides = array<i32>} : memref<1x8x256xf32, #tpu.memory_space<vmem>>, vector<1x8x256xf32>,
    } else {
    }
    return
  }
  func.func @transform_0(%arg0: i32, %arg1: i32, %arg2: i32) -> (i32, i32, i32) {
    %c0_i32 = arith.constant 0 : i32
    %c0_i32_0 = arith.constant 0 : i32
    %c0_i32_1 = arith.constant 0 : i32
    return %arg0, %c0_i32, %c0_i32_0 : i32, i32, i32
  }
  func.func @transform_1(%arg0: i32, %arg1: i32, %arg2: i32) -> (i32, i32, i32) {
    %c0_i32 = arith.constant 0 : i32
    %c0_i32_0 = arith.constant 0 : i32
    return %arg0, %c0_i32, %arg1 : i32, i32, i32
  }
  func.func @transform_2(%arg0: i32, %arg1: i32, %arg2: i32) -> (i32, i32, i32) {
    %c0_i32 = arith.constant 0 : i32
    %c0_i32_0 = arith.constant 0 : i32
    %c0_i32_1 = arith.constant 0 : i32
    return %arg2, %c0_i32, %c0_i32_0 : i32, i32, i32
  }
  func.func @transform_3(%arg0: i32, %arg1: i32, %arg2: i32) -> (i32, i32, i32) {
    %c0_i32 = arith.constant 0 : i32
    %c0_i32_0 = arith.constant 0 : i32
    %c0_i32_1 = arith.constant 0 : i32
    return %arg2, %c0_i32, %c0_i32_0 : i32, i32, i32
  }
  func.func @transform_4(%arg0: i32, %arg1: i32, %arg2: i32) -> (i32, i32) {
    %c0_i32 = arith.constant 0 : i32
    %c0_i32_0 = arith.constant 0 : i32
    %c0_i32_1 = arith.constant 0 : i32
    return %c0_i32, %c0_i32_0 : i32, i32
  }
  func.func @transform_5(%arg0: i32, %arg1: i32, %arg2: i32) -> (i32, i32, i32) {
    %c0_i32 = arith.constant 0 : i32
    %c0_i32_0 = arith.constant 0 : i32
    return %arg0, %c0_i32, %arg1 : i32, i32, i32
  }
}

</mosaic_0001>

<bundles_post_ra>
// kernel: tpu_custom_call.1
= control target key start
LH: loop header
LB: loop body
LE: loop exit
PB: predicated region body
PF: predicated region fallthrough
CT: control target
= control target key end

     0   :  { %10 = vsyncpa [#allocation4], 0  ;;  %s2822_s0 = inlined_call_operand.vmem [shape: f32[2,8,256], index: 0, kind: input, shape index: {}]   ;;  %s2823_s1 = inlined_call_operand.vmem [shape: f32[2,8,256], index: 1, kind: input, shape index: {}]   ;;  %s2824_s2 = inlined_call_operand.vmem [shape: bf16[4,96,8], index: 2, kind: input, shape index: {}]   ;;  %s2825_s3 = inlined_call_operand.vmem [shape: bf16[4,8,32], index: 3, kind: input, shape index: {}]   ;;  %s2826_s4 = inlined_call_operand.vmem [shape: f32[8,1], index: 4, kind: input, shape index: {}]   ;;  %s2827_s5 = inlined_call_operand.hbm [shape: f32[2,8,256], index: 5, kind: output, shape index: {}]  }
   0x1   :  { %12 = vsyncpa [#allocation4 + $0x1], 0  ;;  %s2047_s18 = smov 0   ;;  %s2049_s19 = smov 0  }
   0x2   :  { %s2051_s20 = smov 0   ;;  %s2053_s21 = smov 0  }
   0x3   :  { %s2055_s22 = smov 0   ;;  %s2057_s23 = smov 0  }
   0x4   :  { %s2059_s24 = smov 0   ;;  %s2061_s25 = smov 0  }
   0x5 LB: > { %2862 = sst [smem:[#allocation6_spill]] %s1991_s20  ;;  %s1590_s26 = sadd.s32 4294967295, %s2011_s25   ;;  %s2011_s25 = sphi %s2061_s25, %s18_s25   ;;  %s2007_s24 = sphi %s2059_s24, %s2943_s24   ;;  %s2003_s23 = sphi %s2057_s23, %s2939_s23   ;;  %s1999_s22 = sphi %s2055_s22, %s2938_s22   ;;  %s1995_s21 = sphi %s2053_s21, %s2937_s21   ;;  %s1991_s20 = sphi %s2051_s20, %s2936_s20   ;;  %s1987_s19 = sphi %s2049_s19, %s2942_s19   ;;  %s1983_s18 = sphi %s2047_s18, %s2941_s18  }
   0x6   : > { %2863 = sst [smem:[#allocation7_spill]] %s2003_s23  ;;  %s1591_s27 = sadd.s32 4294967294, %s2011_s25  }
   0x7   : > { %2864 = sst [smem:[#allocation8_spill]] %s2007_s24  ;;  %s30_s28 = sadd.s32 1, %s2003_s23 }
   0x8   : > { %p31_p0 = scmp.ge.s32.totalorder %s30_s28, 4  ;;  %s37_s29 = sadd.s32 1, %s2007_s24 }
   0x9   : > { %p183_p1 = scmp.ne.s32.totalorder %s1991_s20, %s1987_s19  ;;  %p184_p2 = scmp.eq.s32.totalorder %s1590_s26, 7 }
   0xa   : > { %s2945_s28 = smov (%p31_p0, %s30_s28), 0  ;;  %s2947_s29 = smov (!%p31_p0, %s37_s29), %s2007_s24 }
   0xb   : > { %2865 = sst [smem:[#allocation9_spill]] %s2945_s28  ;;  %p2096_p3 = por %p184_p2, %p183_p1 }
   0xc   : > { %p189_p4 = scmp.ne.s32.totalorder %s1987_s19, %s1983_s18  ;;  %p39_p5 = scmp.ge.s32.totalorder %s2947_s29, 2 }
   0xd   : > { %p190_p6 = scmp.eq.s32.totalorder %s1591_s27, 7  ;;  %p1594_p7 = scmp.ge.s32.totalorder %s2011_s25, 1 }
   0xe   : > { %p247_p8 = scmp.lt.s32.totalorder %s2011_s25, 9  ;;  %s2949_s29 = smov (%p39_p5, %s2947_s29), 0 }
   0xf   : > { %2867 = sst [smem:[#allocation10_spill]] %s2949_s29  ;;  %p2106_p9 = por %p190_p6, %p189_p4 }
  0x10   : > { %p248_p10 = pnand %p1594_p7, %p247_p8  ;;  %s168_s7 = ssub.s32 %s2007_s24, %s2949_s29 }
  0x11   : > { %s173_s8 = sadd.s32 1, %s1991_s20  ;;  %p171_p11 = scmp.eq.s32.totalorder %s168_s7, 0 }
  0x12   : > { %251 = sbr.rel (%p248_p10) target bundleno = 1582 (0x62e), region = 40 }
  0x13   : > { %s2114_s9 = scalar_select %p171_p11, %s1991_s20, %s173_s8  }
  0x15   : > { %2869 = sst [smem:[#allocation11_spill]] %s2114_s9 }
  0x19   : > { %s2831_s10 = sand.u32 1, %s1987_s19   ;;  %p293_p12 = scmp.lt.s32.totalorder %s1999_s22, 1 }
  0x1a   : > { %s1595_s11 = sshll.u32 %s2831_s10, 4  ;;  %p308_p13 = scmp.lt.s32.totalorder %s1995_s21, 3 }
  0x1b   : > { %s294_s12 = scalar_select %p293_p12, %s1999_s22, 1 }
  0x1c   : > { %s309_s13 = scalar_select %p308_p13, %s1995_s21, 3 }
  0x1d   : > { %s1640_s14 = sshll.u32 %s294_s12, 4  ;;  %s2139_s12 = scalar_lea.vmem [#allocation3], %s1595_s11 }
  0x1e   : > { %s297_s17 = scalar_lea.vmem %s2822_s0, %s1640_s14  ;;  %s306_s7 = scalar_lea.vmem %s2823_s1, %s1640_s14 }
  0x1f   : > { %s1643_s8 = smul.u32 48, %s309_s13  ;;  %s1601_s29 = sshll.u32 %s309_s13, 2 }
  0x20   : > { %s2132_s23 = scalar_lea.vmem %s2825_s3, %s1601_s29  ;;  %p1602_p0 = scmp.ne.s32.totalorder %s1995_s21, 0 }
  0x21   : > { %s2137_s20 = scalar_lea.vmem %s2824_s2, %s1643_s8  ;;  %v2013_v0 = vmov (!%p1602_p0), 0.0  }
  0x22   : > { %322 = sbr.rel (%p1602_p0) target bundleno = 41 (0x29), region = 44  ;;  %323 = vst [vmem:[#allocation2] sm:$0xff] (!%p1602_p0), %v2013_v0  ;;  %324 = vst [vmem:[#allocation2 + $0x8] sm:$0xff] (!%p1602_p0), %v2013_v0 }
  0x29 PF: > { %v342_v1 = vld [vmem:[%s306_s7 + $0x8] sm:$0xff]  ;;  %vm378_vm0 = vcmask 1043456   ;;  %v341_v2 = vld [vmem:[%s306_s7] sm:$0xff]  ;;  %v2833_v5 = vmov 0   ;;  %vm365_vm1 = vcmask 64512   ;;  %v1720_v13 = vld [vmem:[%s2137_s20 + $0x10] sm:$0xff]  }
  0x2a   : > { %v344_v3 = vpack.c.bf16 %v342_v1, %v342_v1  ;;  %v343_v4 = vpack.c.bf16 %v341_v2, %v341_v2  ;;  %512 = vmatprep.mubr.bf16.mxu1 %v2833_v5  ;;  %417 = vmatprep.mubr.bf16.mxu0 %v2833_v5  ;;  %v1718_v6 = vld [vmem:[%s2137_s20] sm:$0xff]   ;;  %v338_v7 = vld [vmem:[%s297_s17 + $0x8] sm:$0xff]  ;;  %v1721_v15 = vld [vmem:[%s2137_s20 + $0x18] sm:$0xff]   ;;  %vm577_vm2 = vcmask 261120   ;;  %p1634_p1 = scmp.ne.s32.totalorder %s1995_s21, 3 }
  0x2b   : > { %v340_v9 = vpack.c.bf16 %v338_v7, %v338_v7  ;;  %v337_v10 = vld [vmem:[%s297_s17] sm:$0xff]  ;;  %v1719_v14 = vld [vmem:[%s2137_s20 + $0x8] sm:$0xff]  }
  0x2c   : > { %1614 = vmatprep.subr.msk.bf16.mxu1 %vm378_vm0, %v344_v3  ;;  %v475_v8 = vsel %vm378_vm0, %v343_v4, 0  ;;  %v339_v11 = vpack.c.bf16 %v337_v10, %v337_v10 }
  0x2d   : > { %481 = vmatpush1.bf16.msra.mxu1 %v475_v8  ;;  %1607 = vmatprep.subr.msk.bf16.mxu0 %vm378_vm0, %v340_v9 }
  0x2e   : > { %v380_v12 = vsel %vm378_vm0, %v339_v11, 0 }
  0x2f   : > { %386 = vmatpush1.bf16.msra.mxu0 %v380_v12 }
  0x30   : > { %1615 = vmatmul.mubr.msk.bf16.vlgmr.msra.gmra.mrb[0].mxu1 %vm365_vm1, %v1718_v6 }
  0x31   : > { %522 = vmatprep.mubr.bf16.mxu1 %v2833_v5 }
  0x32   : > { %1608 = vmatmul.mubr.msk.bf16.vlgmr.msra.gmra.mrb[0].mxu0 %vm365_vm1, %v1720_v13 }
  0x33   : > { %427 = vmatprep.mubr.bf16.mxu0 %v2833_v5 }
  0x38   : > { %1616 = vmatmul.mubr.msk.bf16.gmra.mrb[4].mxu1 %vm365_vm1, %v1719_v14 }
  0x39   : > { %658 = vmatprep.mubr.bf16.mxu1 %v2833_v5 }
  0x3a   : > { %1609 = vmatmul.mubr.msk.bf16.gmra.mrb[4].mxu0 %vm365_vm1, %v1721_v15 }
  0x3b   : > { %437 = vmatprep.mubr.bf16.mxu0 %v2833_v5 }
 0x103   : > { %v514_v16 = vpop.f32.mrb[0].mxu1 }
 0x104   : > { %v516_v17 = vpop.f32.mrb[1].mxu1 }
 0x105   : > { %v518_v18 = vpop.f32.mrb[2].mxu1  ;;  %v419_v21 = vpop.f32.mrb[0].mxu0 }
 0x106   : > { %v520_v19 = vpop.f32.mrb[3].mxu1  ;;  %v541_v20 = vpack.c.bf16 %v518_v18, %v514_v16  ;;  %v421_v23 = vpop.f32.mrb[1].mxu0 }
 0x107   : > { %v542_v22 = vpack.c.bf16 %v520_v19, %v516_v17  ;;  %v423_v24 = vpop.f32.mrb[2].mxu0 }
 0x108   : > { %545 = vxpose.xlu0.c.b16.start [1/2] (short) %v541_v20, 128  ;;  %v533_v25 = vpack.c.bf16 %v423_v24, %v419_v21  ;;  %v425_v26 = vpop.f32.mrb[3].mxu0 }
 0x109   : > { %561 = vxpose.xlu1.c.b16.start [1/2] (short) %v542_v22, 128  ;;  %v534_v27 = vpack.c.bf16 %v425_v26, %v421_v23 }
 0x10b   : > { %v524_v28 = vpop.f32.mrb[4].mxu1  ;;  %626 = vmatprep.subr.bf16.mxu1 %v534_v27 }
 0x10c   : > { %v526_v29 = vpop.f32.mrb[5].mxu1  ;;  %627 = vmatpush1.bf16.msra.mxu1 %v533_v25 }
 0x10d   : > { %v528_v30 = vpop.f32.mrb[6].mxu1  ;;  %v429_v33 = vpop.f32.mrb[4].mxu0 }
 0x10e   : > { %v543_v31 = vpack.c.bf16 %v528_v30, %v524_v28  ;;  %v530_v32 = vpop.f32.mrb[7].mxu1  ;;  %v431_v35 = vpop.f32.mrb[5].mxu0 }
 0x10f   : > { %v544_v34 = vpack.c.bf16 %v530_v32, %v526_v29  ;;  %v433_v36 = vpop.f32.mrb[6].mxu0 }
 0x110   : > { %546 = vxpose.xlu0.c.b16.end [2/2] (short) %v543_v31, 128  ;;  %v535_v37 = vpack.c.bf16 %v433_v36, %v429_v33  ;;  %v435_v38 = vpop.f32.mrb[7].mxu0 }
 0x111   : > { %562 = vxpose.xlu1.c.b16.end [2/2] (short) %v544_v34, 128  ;;  %v536_v39 = vpack.c.bf16 %v435_v38, %v431_v35 }
 0x113   : > { %628 = vmatprep.subr.bf16.mxu1 %v536_v39 }
 0x114   : > { %629 = vmatpush1.bf16.msra.mxu1 %v535_v37 }
 0x172   : > { %v553_v40 = vpop.trf.xlu0 }
 0x173   : > { %1617 = vmatmul.mubr.msk.bf16.vlgmr.msra.gmra.mrb[8].mxu1 %vm577_vm2, %v553_v40  ;;  %v569_v48 = vpop.trf.xlu1 }
 0x174   : > { %668 = vmatprep.mubr.bf16.mxu1 %v2833_v5 }
 0x176   : > { %v554_v41 = vpop.trf.xlu0 }
 0x177   : > { %v570_v49 = vpop.trf.xlu1 }
 0x17a   : > { %v555_v42 = vpop.trf.xlu0 }
 0x17b   : > { %1618 = vmatmul.mubr.msk.bf16.gmra.mrb[12].mxu1 %vm577_vm2, %v554_v41  ;;  %v571_v50 = vpop.trf.xlu1 }
 0x17c   : > { %678 = vmatprep.mubr.bf16.mxu1 %v2833_v5 }
 0x17e   : > { %v556_v43 = vpop.trf.xlu0 }
 0x17f   : > { %v572_v51 = vpop.trf.xlu1 }
 0x182   : > { %v557_v44 = vpop.trf.xlu0 }
 0x183   : > { %1619 = vmatmul.mubr.msk.bf16.gmra.mrb[16].mxu1 %vm577_vm2, %v555_v42  ;;  %v573_v52 = vpop.trf.xlu1 }
 0x184   : > { %688 = vmatprep.mubr.bf16.mxu1 %v2833_v5 }
 0x186   : > { %v558_v45 = vpop.trf.xlu0 }
 0x187   : > { %v574_v53 = vpop.trf.xlu1 }
 0x18a   : > { %v559_v46 = vpop.trf.xlu0 }
 0x18b   : > { %1620 = vmatmul.mubr.msk.bf16.gmra.mrb[20].mxu1 %vm577_vm2, %v556_v43  ;;  %v575_v54 = vpop.trf.xlu1 }
 0x18c   : > { %698 = vmatprep.mubr.bf16.mxu1 %v2833_v5 }
 0x18e   : > { %v560_v47 = vpop.trf.xlu0 }
 0x18f   : > { %v576_v55 = vpop.trf.xlu1 }
 0x193   : > { %1621 = vmatmul.mubr.msk.bf16.gmra.mrb[24].mxu1 %vm577_vm2, %v557_v44 }
 0x194   : > { %708 = vmatprep.mubr.bf16.mxu1 %v2833_v5 }
 0x19b   : > { %1622 = vmatmul.mubr.msk.bf16.gmra.mrb[28].mxu1 %vm577_vm2, %v558_v45 }
 0x19c   : > { %718 = vmatprep.mubr.bf16.mxu1 %v2833_v5 }
 0x1a3   : > { %1623 = vmatmul.mubr.msk.bf16.gmra.mrb[32].mxu1 %vm577_vm2, %v559_v46 }
 0x1a4   : > { %728 = vmatprep.mubr.bf16.mxu1 %v2833_v5 }
 0x1ab   : > { %1624 = vmatmul.mubr.msk.bf16.gmra.mrb[36].mxu1 %vm577_vm2, %v560_v47 }
 0x1ac   : > { %738 = vmatprep.mubr.bf16.mxu1 %v2833_v5 }
 0x1b3   : > { %1625 = vmatmul.mubr.msk.bf16.gmra.mrb[40].mxu1 %vm577_vm2, %v569_v48 }
 0x1b4   : > { %748 = vmatprep.mubr.bf16.mxu1 %v2833_v5 }
 0x1bb   : > { %1626 = vmatmul.mubr.msk.bf16.gmra.mrb[44].mxu1 %vm577_vm2, %v570_v49 }
 0x1bc   : > { %758 = vmatprep.mubr.bf16.mxu1 %v2833_v5 }
 0x1c3   : > { %1627 = vmatmul.mubr.msk.bf16.gmra.mrb[48].mxu1 %vm577_vm2, %v571_v50 }
 0x1c4   : > { %768 = vmatprep.mubr.bf16.mxu1 %v2833_v5 }
 0x1cb   : > { %1628 = vmatmul.mubr.msk.bf16.gmra.mrb[52].mxu1 %vm577_vm2, %v572_v51 }
 0x1cc   : > { %778 = vmatprep.mubr.bf16.mxu1 %v2833_v5 }
 0x1d3   : > { %1629 = vmatmul.mubr.msk.bf16.gmra.mrb[56].mxu1 %vm577_vm2, %v573_v52 }
 0x1d4   : > { %788 = vmatprep.mubr.bf16.mxu1 %v2833_v5 }
 0x1db   : > { %1630 = vmatmul.mubr.msk.bf16.gmra.mrb[60].mxu1 %vm577_vm2, %v574_v53 }
 0x1dc   : > { %798 = vmatprep.mubr.bf16.mxu1 %v2833_v5 }
 0x1e3   : > { %1631 = vmatmul.mubr.msk.bf16.gmra.mrb[64].mxu1 %vm577_vm2, %v575_v54 }
 0x1e4   : > { %808 = vmatprep.mubr.bf16.mxu1 %v2833_v5 }
 0x1eb   : > { %1632 = vmatmul.mubr.msk.bf16.gmra.mrb[68].mxu1 %vm577_vm2, %v576_v55 }
 0x246   : > { %v2191_v56 = vpop.f32.mrb[8].mxu1 }
 0x247   : > { %v2193_v57 = vpop.f32.mrb[9].mxu1 }
 0x248   : > { %v2195_v58 = vpop.f32.mrb[10].mxu1  ;;  %v819_v59 = vmax.f32 %v2191_v56, %v2193_v57 }
 0x249   : > { %v2199_v60 = vpop.f32.mrb[11].mxu1 }
 0x24a   : > { %820 = vmax.xlane.f32.xlu0 %v819_v59  ;;  %v822_v61 = vmax.f32 %v2195_v58, %v2199_v60 }
 0x24c   : > { %823 = vmax.xlane.f32.xlu1 %v822_v61 }
 0x24e   : > { %v2203_v62 = vpop.f32.mrb[12].mxu1 }
 0x24f   : > { %v2205_v63 = vpop.f32.mrb[13].mxu1 }
 0x250   : > { %v2207_v0 = vpop.f32.mrb[14].mxu1  ;;  %v825_v1 = vmax.f32 %v2203_v62, %v2205_v63 }
 0x251   : > { %v2211_v2 = vpop.f32.mrb[15].mxu1 }
 0x252   : > { %826 = vmax.xlane.f32.xlu0 %v825_v1  ;;  %v828_v3 = vmax.f32 %v2207_v0, %v2211_v2 }
 0x254   : > { %829 = vmax.xlane.f32.xlu1 %v828_v3 }
 0x256   : > { %v2215_v4 = vpop.f32.mrb[16].mxu1 }
 0x257   : > { %v2217_v6 = vpop.f32.mrb[17].mxu1 }
 0x258   : > { %v2219_v7 = vpop.f32.mrb[18].mxu1  ;;  %v831_v8 = vmax.f32 %v2215_v4, %v2217_v6 }
 0x259   : > { %v2223_v9 = vpop.f32.mrb[19].mxu1 }
 0x25a   : > { %832 = vmax.xlane.f32.xlu0 %v831_v8  ;;  %v834_v10 = vmax.f32 %v2219_v7, %v2223_v9 }
 0x25c   : > { %835 = vmax.xlane.f32.xlu1 %v834_v10 }
 0x25e   : > { %v2227_v11 = vpop.f32.mrb[20].mxu1 }
 0x25f   : > { %v2229_v12 = vpop.f32.mrb[21].mxu1 }
 0x260   : > { %v2231_v13 = vpop.f32.mrb[22].mxu1  ;;  %v837_v14 = vmax.f32 %v2227_v11, %v2229_v12 }
 0x261   : > { %v2235_v15 = vpop.f32.mrb[23].mxu1 }
 0x262   : > { %838 = vmax.xlane.f32.xlu0 %v837_v14  ;;  %v840_v16 = vmax.f32 %v2231_v13, %v2235_v15 }
 0x264   : > { %841 = vmax.xlane.f32.xlu1 %v840_v16 }
 0x266   : > { %v2239_v17 = vpop.f32.mrb[24].mxu1 }
 0x267   : > { %v2241_v18 = vpop.f32.mrb[25].mxu1 }
 0x268   : > { %v2243_v19 = vpop.f32.mrb[26].mxu1  ;;  %v843_v20 = vmax.f32 %v2239_v17, %v2241_v18 }
 0x269   : > { %v2247_v21 = vpop.f32.mrb[27].mxu1 }
 0x26a   : > { %844 = vmax.xlane.f32.xlu0 %v843_v20  ;;  %v846_v22 = vmax.f32 %v2243_v19, %v2247_v21 }
 0x26c   : > { %847 = vmax.xlane.f32.xlu1 %v846_v22 }
 0x26e   : > { %v2251_v23 = vpop.f32.mrb[28].mxu1 }
 0x26f   : > { %v2253_v24 = vpop.f32.mrb[29].mxu1 }
 0x270   : > { %v2255_v25 = vpop.f32.mrb[30].mxu1  ;;  %v849_v26 = vmax.f32 %v2251_v23, %v2253_v24 }
 0x271   : > { %v2259_v27 = vpop.f32.mrb[31].mxu1 }
 0x272   : > { %850 = vmax.xlane.f32.xlu0 %v849_v26  ;;  %v852_v28 = vmax.f32 %v2255_v25, %v2259_v27 }
 0x274   : > { %853 = vmax.xlane.f32.xlu1 %v852_v28 }
 0x276   : > { %v2263_v29 = vpop.f32.mrb[32].mxu1 }
 0x277   : > { %v2265_v30 = vpop.f32.mrb[33].mxu1 }
 0x278   : > { %v2267_v31 = vpop.f32.mrb[34].mxu1  ;;  %v855_v32 = vmax.f32 %v2263_v29, %v2265_v30 }
 0x279   : > { %v2271_v33 = vpop.f32.mrb[35].mxu1 }
 0x27a   : > { %856 = vmax.xlane.f32.xlu0 %v855_v32  ;;  %v858_v34 = vmax.f32 %v2267_v31, %v2271_v33 }
 0x27c   : > { %859 = vmax.xlane.f32.xlu1 %v858_v34 }
 0x27e   : > { %v2275_v35 = vpop.f32.mrb[36].mxu1 }
 0x27f   : > { %v2277_v36 = vpop.f32.mrb[37].mxu1 }
 0x280   : > { %v2279_v37 = vpop.f32.mrb[38].mxu1  ;;  %v861_v38 = vmax.f32 %v2275_v35, %v2277_v36 }
 0x281   : > { %v2283_v39 = vpop.f32.mrb[39].mxu1 }
 0x282   : > { %862 = vmax.xlane.f32.xlu0 %v861_v38  ;;  %v864_v40 = vmax.f32 %v2279_v37, %v2283_v39  ;;  %v1722_v38 = vld [vmem:[%s2137_s20 + $0x20] sm:$0xff]  }
 0x283   : > { %1610 = vmatmul.mubr.msk.bf16.gmra.mrb[8].mxu0 %vm365_vm1, %v1722_v38 }
 0x284   : > { %865 = vmax.xlane.f32.xlu1 %v864_v40 }
 0x286   : > { %v2287_v41 = vpop.f32.mrb[40].mxu1 }
 0x287   : > { %v2289_v42 = vpop.f32.mrb[41].mxu1 }
 0x288   : > { %v2291_v43 = vpop.f32.mrb[42].mxu1  ;;  %v867_v44 = vmax.f32 %v2287_v41, %v2289_v42 }
 0x289   : > { %v2295_v45 = vpop.f32.mrb[43].mxu1 }
 0x28a   : > { %2870 = vst [vmem:[#allocation12_spill] sm:$0xff] %v2295_v45  ;;  %868 = vmax.xlane.f32.xlu0 %v867_v44  ;;  %v870_v46 = vmax.f32 %v2291_v43, %v2295_v45 }
 0x28c   : > { %871 = vmax.xlane.f32.xlu1 %v870_v46 }
 0x28e   : > { %v2299_v47 = vpop.f32.mrb[44].mxu1 }
 0x28f   : > { %2871 = vst [vmem:[#allocation13_spill] sm:$0xff] %v2299_v47  ;;  %v2301_v48 = vpop.f32.mrb[45].mxu1 }
 0x290   : > { %2872 = vst [vmem:[#allocation14_spill] sm:$0xff] %v2301_v48  ;;  %v2303_v49 = vpop.f32.mrb[46].mxu1  ;;  %v873_v50 = vmax.f32 %v2299_v47, %v2301_v48 }
 0x291   : > { %2873 = vst [vmem:[#allocation15_spill] sm:$0xff] %v2303_v49  ;;  %v2307_v51 = vpop.f32.mrb[47].mxu1 }
 0x292   : > { %2874 = vst [vmem:[#allocation16_spill] sm:$0xff] %v2307_v51  ;;  %874 = vmax.xlane.f32.xlu0 %v873_v50  ;;  %v876_v52 = vmax.f32 %v2303_v49, %v2307_v51  ;;  %v1723_v50 = vld [vmem:[%s2137_s20 + $0x28] sm:$0xff]  }
 0x294   : > { %877 = vmax.xlane.f32.xlu1 %v876_v52 }
 0x296   : > { %v2311_v53 = vpop.f32.mrb[48].mxu1 }
 0x297   : > { %2875 = vst [vmem:[#allocation17_spill] sm:$0xff] %v2311_v53  ;;  %v2313_v54 = vpop.f32.mrb[49].mxu1 }
 0x298   : > { %2876 = vst [vmem:[#allocation18_spill] sm:$0xff] %v2313_v54  ;;  %v2315_v55 = vpop.f32.mrb[50].mxu1  ;;  %v879_v59 = vmax.f32 %v2311_v53, %v2313_v54 }
 0x299   : > { %2877 = vst [vmem:[#allocation19_spill] sm:$0xff] %v2315_v55  ;;  %v2319_v61 = vpop.f32.mrb[51].mxu1 }
 0x29a   : > { %2878 = vst [vmem:[#allocation20_spill] sm:$0xff] %v2319_v61  ;;  %880 = vmax.xlane.f32.xlu0 %v879_v59  ;;  %v882_v1 = vmax.f32 %v2315_v55, %v2319_v61  ;;  %v2883_v61 = vmov 0  }
 0x29b   : > { %447 = vmatprep.mubr.bf16.mxu0 %v2883_v61 }
 0x29c   : > { %883 = vmax.xlane.f32.xlu1 %v882_v1  ;;  %1611 = vmatmul.mubr.msk.bf16.gmra.mrb[12].mxu0 %vm365_vm1, %v1723_v50 }
 0x29e   : > { %v2323_v3 = vpop.f32.mrb[52].mxu1 }
 0x29f   : > { %2879 = vst [vmem:[#allocation21_spill] sm:$0xff] %v2323_v3  ;;  %v2325_v8 = vpop.f32.mrb[53].mxu1 }
 0x2a0   : > { %2880 = vst [vmem:[#allocation22_spill] sm:$0xff] %v2325_v8  ;;  %v2327_v10 = vpop.f32.mrb[54].mxu1  ;;  %v885_v14 = vmax.f32 %v2323_v3, %v2325_v8 }
 0x2a1   : > { %2881 = vst [vmem:[#allocation23_spill] sm:$0xff] %v2327_v10  ;;  %v2331_v16 = vpop.f32.mrb[55].mxu1 }
 0x2a2   : > { %2882 = vst [vmem:[#allocation24_spill] sm:$0xff] %v2331_v16  ;;  %886 = vmax.xlane.f32.xlu0 %v885_v14  ;;  %v888_v20 = vmax.f32 %v2327_v10, %v2331_v16 }
 0x2a4   : > { %889 = vmax.xlane.f32.xlu1 %v888_v20 }
 0x2a6   : > { %v2335_v22 = vpop.f32.mrb[56].mxu1 }
 0x2a7   : > { %v2337_v26 = vpop.f32.mrb[57].mxu1 }
 0x2a8   : > { %v2339_v28 = vpop.f32.mrb[58].mxu1 }
 0x2a9   : > { %v2343_v34 = vpop.f32.mrb[59].mxu1 }
 0x2ae   : > { %v2347_v40 = vpop.f32.mrb[60].mxu1 }
 0x2af   : > { %v2349_v44 = vpop.f32.mrb[61].mxu1 }
 0x2b0   : > { %v2351_v46 = vpop.f32.mrb[62].mxu1 }
 0x2b1   : > { %v2355_v52 = vpop.f32.mrb[63].mxu1 }
 0x2b6   : > { %v2359_v1 = vpop.f32.mrb[64].mxu1 }
 0x2b7   : > { %v2361_v14 = vpop.f32.mrb[65].mxu1 }
 0x2b8   : > { %v2363_v20 = vpop.f32.mrb[66].mxu1 }
 0x2b9   : > { %v2367_v32 = vpop.f32.mrb[67].mxu1 }
 0x2be   : > { %v2371_v5 = vpop.f32.mrb[68].mxu1 }
 0x2bf   : > { %v2373_v16 = vpop.f32.mrb[69].mxu1 }
 0x2c0   : > { %v2375_v59 = vpop.f32.mrb[70].mxu1 }
 0x2c1   : > { %v2379_v8 = vpop.f32.mrb[71].mxu1 }
 0x2d7   : > { %v821_v55 = vpop.xlane.xlu0 %820 }
 0x2d8   : > { %v915_v54 = vsub.f32 %v2191_v56, %v821_v55  ;;  %v916_v53 = vsub.f32 %v2193_v57, %v821_v55 }
 0x2d9   : > { %v824_v51 = vpop.xlane.xlu1 %823 }
 0x2da   : > { %v979_v10 = vmul.f32 1.442695, %v915_v54  ;;  %v981_v49 = vmul.f32 1.442695, %v916_v53  ;;  %v917_v48 = vsub.f32 %v2195_v58, %v824_v51  ;;  %v918_v3 = vsub.f32 %v2199_v60, %v824_v51 }
 0x2dc   : > { %1724 = vpow2.f32 %v979_v10  ;;  %v983_v47 = vmul.f32 1.442695, %v917_v48  ;;  %v985_v38 = vmul.f32 1.442695, %v918_v3 }
 0x2dd   : > { %1726 = vpow2.f32 %v981_v49 }
 0x2de   : > { %1728 = vpow2.f32 %v983_v47 }
 0x2df   : > { %1730 = vpow2.f32 %v985_v38  ;;  %v827_v61 = vpop.xlane.xlu0 %826 }
 0x2e0   : > { %v919_v50 = vsub.f32 %v2203_v62, %v827_v61  ;;  %v920_v56 = vsub.f32 %v2205_v63, %v827_v61 }
 0x2e1   : > { %v830_v45 = vpop.xlane.xlu1 %829 }
 0x2e2   : > { %v987_v57 = vmul.f32 1.442695, %v919_v50  ;;  %v989_v55 = vmul.f32 1.442695, %v920_v56  ;;  %v921_v53 = vsub.f32 %v2207_v0, %v830_v45  ;;  %v922_v58 = vsub.f32 %v2211_v2, %v830_v45 }
 0x2e4   : > { %1732 = vpow2.f32 %v987_v57  ;;  %v991_v60 = vmul.f32 1.442695, %v921_v53  ;;  %v993_v51 = vmul.f32 1.442695, %v922_v58  ;;  %v2884_v57 = vmax.f32 %v2335_v22, %v2337_v26 }
 0x2e5   : > { %1734 = vpow2.f32 %v989_v55 }
 0x2e6   : > { %v2396_v48 = vpop.eup %1724  ;;  %1736 = vpow2.f32 %v991_v60 }
 0x2e7   : > { %v2398_v47 = vpop.eup %1726  ;;  %1738 = vpow2.f32 %v993_v51  ;;  %v833_v62 = vpop.xlane.xlu0 %832 }
 0x2e8   : > { %v2400_v49 = vpop.eup %1728  ;;  %v923_v63 = vsub.f32 %v2215_v4, %v833_v62  ;;  %v924_v54 = vsub.f32 %v2217_v6, %v833_v62  ;;  %v1107_v0 = vadd.f32 %v2398_v47, %v2396_v48  ;;  %v2885_v62 = vmax.f32 %v2339_v28, %v2343_v34 }
 0x2e9   : > { %v2406_v2 = vpop.eup %1730  ;;  %v836_v45 = vpop.xlane.xlu1 %835 }
 0x2ea   : > { %v995_v61 = vmul.f32 1.442695, %v923_v63  ;;  %v997_v3 = vmul.f32 1.442695, %v924_v54  ;;  %1108 = vadd.xlane.f32.xlu0 %v1107_v0  ;;  %v925_v10 = vsub.f32 %v2219_v7, %v836_v45  ;;  %v926_v38 = vsub.f32 %v2223_v9, %v836_v45 }
 0x2eb   : > { %v1110_v50 = vadd.f32 %v2406_v2, %v2400_v49 }
 0x2ec   : > { %1740 = vpow2.f32 %v995_v61  ;;  %v999_v4 = vmul.f32 1.442695, %v925_v10  ;;  %v1001_v56 = vmul.f32 1.442695, %v926_v38  ;;  %v2886_v38 = vmax.f32 %v2347_v40, %v2349_v44 }
 0x2ed   : > { %1742 = vpow2.f32 %v997_v3  ;;  %1111 = vadd.xlane.f32.xlu1 %v1110_v50 }
 0x2ee   : > { %v2412_v6 = vpop.eup %1732  ;;  %1744 = vpow2.f32 %v999_v4  ;;  %892 = vmax.xlane.f32.xlu0 %v2884_v57 }
 0x2ef   : > { %v2417_v55 = vpop.eup %1734  ;;  %1746 = vpow2.f32 %v1001_v56  ;;  %v839_v7 = vpop.xlane.xlu0 %838 }
 0x2f0   : > { %v2419_v9 = vpop.eup %1736  ;;  %v927_v53 = vsub.f32 %v2227_v11, %v839_v7  ;;  %v928_v58 = vsub.f32 %v2229_v12, %v839_v7  ;;  %v1113_v60 = vadd.f32 %v2417_v55, %v2412_v6 }
 0x2f1   : > { %v2425_v51 = vpop.eup %1738  ;;  %895 = vmax.xlane.f32.xlu1 %v2885_v62  ;;  %v842_v63 = vpop.xlane.xlu1 %841 }
 0x2f2   : > { %v1003_v54 = vmul.f32 1.442695, %v927_v53  ;;  %v1005_v0 = vmul.f32 1.442695, %v928_v58  ;;  %1114 = vadd.xlane.f32.xlu0 %v1113_v60  ;;  %v929_v45 = vsub.f32 %v2231_v13, %v842_v63  ;;  %v930_v61 = vsub.f32 %v2235_v15, %v842_v63 }
 0x2f3   : > { %v1116_v11 = vadd.f32 %v2425_v51, %v2419_v9  ;;  %v2887_v53 = vmax.f32 %v2351_v46, %v2355_v52 }
 0x2f4   : > { %1748 = vpow2.f32 %v1003_v54  ;;  %v1007_v12 = vmul.f32 1.442695, %v929_v45  ;;  %v1009_v3 = vmul.f32 1.442695, %v930_v61  ;;  %v2888_v61 = vmax.f32 %v2359_v1, %v2361_v14 }
 0x2f5   : > { %1750 = vpow2.f32 %v1005_v0  ;;  %1117 = vadd.xlane.f32.xlu1 %v1116_v11 }
 0x2f6   : > { %v2434_v10 = vpop.eup %1740  ;;  %1752 = vpow2.f32 %v1007_v12  ;;  %898 = vmax.xlane.f32.xlu0 %v2886_v38 }
 0x2f7   : > { %v2439_v50 = vpop.eup %1742  ;;  %1754 = vpow2.f32 %v1009_v3  ;;  %v845_v13 = vpop.xlane.xlu0 %844 }
 0x2f8   : > { %v2441_v15 = vpop.eup %1744  ;;  %v931_v4 = vsub.f32 %v2239_v17, %v845_v13  ;;  %v932_v56 = vsub.f32 %v2241_v18, %v845_v13  ;;  %v1119_v57 = vadd.f32 %v2439_v50, %v2434_v10 }
 0x2f9   : > { %v2447_v7 = vpop.eup %1746  ;;  %901 = vmax.xlane.f32.xlu1 %v2887_v53  ;;  %v848_v58 = vpop.xlane.xlu1 %847 }
 0x2fa   : > { %v1011_v60 = vmul.f32 1.442695, %v931_v4  ;;  %v1013_v62 = vmul.f32 1.442695, %v932_v56  ;;  %1120 = vadd.xlane.f32.xlu0 %v1119_v57  ;;  %v933_v63 = vsub.f32 %v2243_v19, %v848_v58  ;;  %v934_v54 = vsub.f32 %v2247_v21, %v848_v58 }
 0x2fb   : > { %v1122_v17 = vadd.f32 %v2447_v7, %v2441_v15  ;;  %v2889_v4 = vmax.f32 %v2363_v20, %v2367_v32 }
 0x2fc   : > { %1756 = vpow2.f32 %v1011_v60  ;;  %v1015_v18 = vmul.f32 1.442695, %v933_v63  ;;  %v1017_v0 = vmul.f32 1.442695, %v934_v54  ;;  %v2890_v54 = vmax.f32 %v2371_v5, %v2373_v16 }
 0x2fd   : > { %1758 = vpow2.f32 %v1013_v62  ;;  %1123 = vadd.xlane.f32.xlu1 %v1122_v17 }
 0x2fe   : > { %v2456_v45 = vpop.eup %1748  ;;  %1760 = vpow2.f32 %v1015_v18  ;;  %904 = vmax.xlane.f32.xlu0 %v2888_v61 }
 0x2ff   : > { %v2461_v11 = vpop.eup %1750  ;;  %1762 = vpow2.f32 %v1017_v0  ;;  %v851_v19 = vpop.xlane.xlu0 %850 }
 0x300   : > { %v2463_v21 = vpop.eup %1752  ;;  %v935_v12 = vsub.f32 %v2251_v23, %v851_v19  ;;  %v936_v3 = vsub.f32 %v2253_v24, %v851_v19  ;;  %v1125_v38 = vadd.f32 %v2461_v11, %v2456_v45 }
 0x301   : > { %v2469_v13 = vpop.eup %1754  ;;  %907 = vmax.xlane.f32.xlu1 %v2889_v4  ;;  %v854_v56 = vpop.xlane.xlu1 %853 }
 0x302   : > { %v1019_v57 = vmul.f32 1.442695, %v935_v12  ;;  %v1021_v53 = vmul.f32 1.442695, %v936_v3  ;;  %1126 = vadd.xlane.f32.xlu0 %v1125_v38  ;;  %v937_v58 = vsub.f32 %v2255_v25, %v854_v56  ;;  %v938_v60 = vsub.f32 %v2259_v27, %v854_v56 }
 0x303   : > { %v1128_v23 = vadd.f32 %v2469_v13, %v2463_v21  ;;  %v2891_v12 = vmax.f32 %v2375_v59, %v2379_v8 }
 0x304   : > { %1764 = vpow2.f32 %v1019_v57  ;;  %v1023_v24 = vmul.f32 1.442695, %v937_v58  ;;  %v1025_v62 = vmul.f32 1.442695, %v938_v60 }
 0x305   : > { %1766 = vpow2.f32 %v1021_v53  ;;  %1129 = vadd.xlane.f32.xlu1 %v1128_v23 }
 0x306   : > { %v2478_v63 = vpop.eup %1756  ;;  %1768 = vpow2.f32 %v1023_v24  ;;  %910 = vmax.xlane.f32.xlu0 %v2890_v54 }
 0x307   : > { %v2483_v17 = vpop.eup %1758  ;;  %1770 = vpow2.f32 %v1025_v62  ;;  %v857_v25 = vpop.xlane.xlu0 %856 }
 0x308   : > { %v2485_v27 = vpop.eup %1760  ;;  %v939_v18 = vsub.f32 %v2263_v29, %v857_v25  ;;  %v940_v0 = vsub.f32 %v2265_v30, %v857_v25  ;;  %v1131_v61 = vadd.f32 %v2483_v17, %v2478_v63 }
 0x309   : > { %v2491_v19 = vpop.eup %1762  ;;  %913 = vmax.xlane.f32.xlu1 %v2891_v12  ;;  %v860_v3 = vpop.xlane.xlu1 %859 }
 0x30a   : > { %v1027_v38 = vmul.f32 1.442695, %v939_v18  ;;  %v1029_v4 = vmul.f32 1.442695, %v940_v0  ;;  %1132 = vadd.xlane.f32.xlu0 %v1131_v61  ;;  %v941_v56 = vsub.f32 %v2267_v31, %v860_v3  ;;  %v942_v57 = vsub.f32 %v2271_v33, %v860_v3 }
 0x30b   : > { %v1134_v29 = vadd.f32 %v2491_v19, %v2485_v27 }
 0x30c   : > { %1772 = vpow2.f32 %v1027_v38  ;;  %v1031_v30 = vmul.f32 1.442695, %v941_v56  ;;  %v1033_v53 = vmul.f32 1.442695, %v942_v57 }
 0x30d   : > { %1774 = vpow2.f32 %v1029_v4  ;;  %1135 = vadd.xlane.f32.xlu1 %v1134_v29 }
 0x30e   : > { %v2500_v58 = vpop.eup %1764  ;;  %1776 = vpow2.f32 %v1031_v30 }
 0x30f   : > { %v2502_v60 = vpop.eup %1766  ;;  %1778 = vpow2.f32 %v1033_v53  ;;  %v863_v23 = vpop.xlane.xlu0 %862 }
 0x310   : > { %v2504_v24 = vpop.eup %1768  ;;  %v943_v31 = vsub.f32 %v2275_v35, %v863_v23  ;;  %v944_v33 = vsub.f32 %v2277_v36, %v863_v23  ;;  %v1137_v62 = vadd.f32 %v2502_v60, %v2500_v58 }
 0x311   : > { %v2510_v54 = vpop.eup %1770  ;;  %v866_v25 = vpop.xlane.xlu1 %865 }
 0x312   : > { %v1035_v18 = vmul.f32 1.442695, %v943_v31  ;;  %v1037_v0 = vmul.f32 1.442695, %v944_v33  ;;  %1138 = vadd.xlane.f32.xlu0 %v1137_v62  ;;  %v945_v61 = vsub.f32 %v2279_v37, %v866_v25  ;;  %v946_v12 = vsub.f32 %v2283_v39, %v866_v25  ;;  %v2892_v62 = vld [vmem:[#allocation12_spill] sm:$0xff] }
 0x313   : > { %v1140_v3 = vadd.f32 %v2510_v54, %v2504_v24 }
 0x314   : > { %1780 = vpow2.f32 %v1035_v18  ;;  %v1039_v35 = vmul.f32 1.442695, %v945_v61  ;;  %v1041_v38 = vmul.f32 1.442695, %v946_v12 }
 0x315   : > { %1782 = vpow2.f32 %v1037_v0  ;;  %1141 = vadd.xlane.f32.xlu1 %v1140_v3 }
 0x316   : > { %v2516_v36 = vpop.eup %1772  ;;  %1784 = vpow2.f32 %v1039_v35 }
 0x317   : > { %v2518_v4 = vpop.eup %1774  ;;  %1786 = vpow2.f32 %v1041_v38  ;;  %v869_v56 = vpop.xlane.xlu0 %868  ;;  %v2896_v38 = vld [vmem:[#allocation14_spill] sm:$0xff] }
 0x318   : > { %v2520_v57 = vpop.eup %1776  ;;  %v947_v37 = vsub.f32 %v2287_v41, %v869_v56  ;;  %v948_v39 = vsub.f32 %v2289_v42, %v869_v56  ;;  %v1143_v29 = vadd.f32 %v2518_v4, %v2516_v36 }
 0x319   : > { %v2526_v30 = vpop.eup %1778  ;;  %v872_v53 = vpop.xlane.xlu1 %871 }
 0x31a   : > { %v1043_v23 = vmul.f32 1.442695, %v947_v37  ;;  %v1045_v31 = vmul.f32 1.442695, %v948_v39  ;;  %1144 = vadd.xlane.f32.xlu0 %v1143_v29  ;;  %v949_v33 = vsub.f32 %v2291_v43, %v872_v53  ;;  %v950_v25 = vsub.f32 %v2892_v62, %v872_v53  ;;  %v2895_v43 = vld [vmem:[#allocation13_spill] sm:$0xff]  ;;  %v2899_v62 = vld [vmem:[#allocation16_spill] sm:$0xff] }
 0x31b   : > { %v1146_v18 = vadd.f32 %v2526_v30, %v2520_v57 }
 0x31c   : > { %1788 = vpow2.f32 %v1043_v23  ;;  %v1047_v41 = vmul.f32 1.442695, %v949_v33  ;;  %v1049_v0 = vmul.f32 1.442695, %v950_v25 }
 0x31d   : > { %1790 = vpow2.f32 %v1045_v31  ;;  %1147 = vadd.xlane.f32.xlu1 %v1146_v18  ;;  %v2898_v31 = vld [vmem:[#allocation15_spill] sm:$0xff] }
 0x31e   : > { %v2532_v42 = vpop.eup %1780  ;;  %1792 = vpow2.f32 %v1047_v41 }
 0x31f   : > { %2893 = vst [vmem:[#allocation12_spill] sm:$0xff] %v2532_v42  ;;  %v2534_v61 = vpop.eup %1782  ;;  %1794 = vpow2.f32 %v1049_v0  ;;  %v875_v12 = vpop.xlane.xlu0 %874 }
 0x320   : > { %v2536_v3 = vpop.eup %1784  ;;  %v951_v35 = vsub.f32 %v2895_v43, %v875_v12  ;;  %v952_v56 = vsub.f32 %v2896_v38, %v875_v12  ;;  %v1149_v37 = vadd.f32 %v2534_v61, %v2532_v42  ;;  %v2907_v42 = vld [vmem:[#allocation20_spill] sm:$0xff] }
 0x321   : > { %2894 = vst [vmem:[#allocation25_spill] sm:$0xff] %v2536_v3  ;;  %v2542_v39 = vpop.eup %1786  ;;  %v878_v29 = vpop.xlane.xlu1 %877 }
 0x322   : > { %2897 = vst [vmem:[#allocation13_spill] sm:$0xff] %v2542_v39  ;;  %v1051_v53 = vmul.f32 1.442695, %v951_v35  ;;  %v1053_v23 = vmul.f32 1.442695, %v952_v56  ;;  %1150 = vadd.xlane.f32.xlu0 %v1149_v37  ;;  %v953_v33 = vsub.f32 %v2898_v31, %v878_v29  ;;  %v954_v25 = vsub.f32 %v2899_v62, %v878_v29  ;;  %v2903_v56 = vld [vmem:[#allocation17_spill] sm:$0xff] }
 0x323   : > { %v1152_v18 = vadd.f32 %v2542_v39, %v2536_v3  ;;  %v2904_v29 = vld [vmem:[#allocation18_spill] sm:$0xff] }
 0x324   : > { %1796 = vpow2.f32 %v1051_v53  ;;  %v1055_v41 = vmul.f32 1.442695, %v953_v33  ;;  %v1057_v0 = vmul.f32 1.442695, %v954_v25 }
 0x325   : > { %1798 = vpow2.f32 %v1053_v23  ;;  %1153 = vadd.xlane.f32.xlu1 %v1152_v18  ;;  %v2906_v18 = vld [vmem:[#allocation19_spill] sm:$0xff] }
 0x326   : > { %v2548_v12 = vpop.eup %1788  ;;  %1800 = vpow2.f32 %v1055_v41 }
 0x327   : > { %2900 = vst [vmem:[#allocation14_spill] sm:$0xff] %v2548_v12  ;;  %v2550_v43 = vpop.eup %1790  ;;  %1802 = vpow2.f32 %v1057_v0  ;;  %v881_v35 = vpop.xlane.xlu0 %880 }
 0x328   : > { %2901 = vst [vmem:[#allocation15_spill] sm:$0xff] %v2550_v43  ;;  %v2552_v38 = vpop.eup %1792  ;;  %v955_v37 = vsub.f32 %v2903_v56, %v881_v35  ;;  %v956_v31 = vsub.f32 %v2904_v29, %v881_v35  ;;  %v1155_v53 = vadd.f32 %v2550_v43, %v2548_v12 }
 0x329   : > { %2902 = vst [vmem:[#allocation16_spill] sm:$0xff] %v2552_v38  ;;  %v2558_v33 = vpop.eup %1794  ;;  %v884_v23 = vpop.xlane.xlu1 %883 }
 0x32a   : > { %2905 = vst [vmem:[#allocation17_spill] sm:$0xff] %v2558_v33  ;;  %v1059_v62 = vmul.f32 1.442695, %v955_v37  ;;  %v1061_v25 = vmul.f32 1.442695, %v956_v31  ;;  %1156 = vadd.xlane.f32.xlu0 %v1155_v53  ;;  %v957_v41 = vsub.f32 %v2906_v18, %v884_v23  ;;  %v958_v0 = vsub.f32 %v2907_v42, %v884_v23  ;;  %v2908_v53 = vld [vmem:[#allocation21_spill] sm:$0xff] }
 0x32b   : > { %v1158_v3 = vadd.f32 %v2558_v33, %v2552_v38  ;;  %v2909_v42 = vld [vmem:[#allocation22_spill] sm:$0xff]  ;;  %v2911_v38 = vld [vmem:[#allocation24_spill] sm:$0xff] }
 0x32c   : > { %1804 = vpow2.f32 %v1059_v62  ;;  %v1063_v56 = vmul.f32 1.442695, %v957_v41  ;;  %v1065_v39 = vmul.f32 1.442695, %v958_v0 }
 0x32d   : > { %1806 = vpow2.f32 %v1061_v25  ;;  %1159 = vadd.xlane.f32.xlu1 %v1158_v3 }
 0x32e   : > { %v2564_v35 = vpop.eup %1796  ;;  %1808 = vpow2.f32 %v1063_v56  ;;  %v2910_v56 = vld [vmem:[#allocation23_spill] sm:$0xff] }
 0x32f   : > { %v2566_v29 = vpop.eup %1798  ;;  %1810 = vpow2.f32 %v1065_v39  ;;  %v887_v37 = vpop.xlane.xlu0 %886 }
 0x330   : > { %v2568_v31 = vpop.eup %1800  ;;  %v959_v18 = vsub.f32 %v2908_v53, %v887_v37  ;;  %v960_v23 = vsub.f32 %v2909_v42, %v887_v37  ;;  %v1161_v62 = vadd.f32 %v2566_v29, %v2564_v35 }
 0x331   : > { %v2574_v41 = vpop.eup %1802  ;;  %v890_v25 = vpop.xlane.xlu1 %889 }
 0x332   : > { %v1067_v3 = vmul.f32 1.442695, %v959_v18  ;;  %v1069_v0 = vmul.f32 1.442695, %v960_v23  ;;  %1162 = vadd.xlane.f32.xlu0 %v1161_v62  ;;  %v961_v12 = vsub.f32 %v2910_v56, %v890_v25  ;;  %v962_v39 = vsub.f32 %v2911_v38, %v890_v25 }
 0x333   : > { %v1164_v33 = vadd.f32 %v2574_v41, %v2568_v31 }
 0x334   : > { %1812 = vpow2.f32 %v1067_v3  ;;  %v1071_v53 = vmul.f32 1.442695, %v961_v12  ;;  %v1073_v43 = vmul.f32 1.442695, %v962_v39 }
 0x335   : > { %1814 = vpow2.f32 %v1069_v0  ;;  %1165 = vadd.xlane.f32.xlu1 %v1164_v33 }
 0x336   : > { %v2580_v37 = vpop.eup %1804  ;;  %1816 = vpow2.f32 %v1071_v53 }
 0x337   : > { %2912 = vst [vmem:[#allocation18_spill] sm:$0xff] %v2580_v37  ;;  %v2582_v42 = vpop.eup %1806  ;;  %1818 = vpow2.f32 %v1073_v43 }
 0x338   : > { %v2584_v18 = vpop.eup %1808  ;;  %v1167_v23 = vadd.f32 %v2582_v42, %v2580_v37 }
 0x339   : > { %2913 = vst [vmem:[#allocation19_spill] sm:$0xff] %v2584_v18  ;;  %v2588_v38 = vpop.eup %1810 }
 0x33a   : > { %2914 = vst [vmem:[#allocation20_spill] sm:$0xff] %v2588_v38  ;;  %1168 = vadd.xlane.f32.xlu0 %v1167_v23  ;;  %v1170_v12 = vadd.f32 %v2588_v38, %v2584_v18 }
 0x33c   : > { %1171 = vadd.xlane.f32.xlu1 %v1170_v12 }
 0x33e   : > { %v2592_v62 = vpop.eup %1812 }
 0x33f   : > { %2915 = vst [vmem:[#allocation21_spill] sm:$0xff] %v2592_v62  ;;  %v2594_v33 = vpop.eup %1814 }
 0x340   : > { %2916 = vst [vmem:[#allocation22_spill] sm:$0xff] %v2594_v33  ;;  %v2596_v25 = vpop.eup %1816  ;;  %v1173_v43 = vadd.f32 %v2594_v33, %v2592_v62 }
 0x341   : > { %2917 = vst [vmem:[#allocation23_spill] sm:$0xff] %v2596_v25  ;;  %v2600_v3 = vpop.eup %1818 }
 0x342   : > { %2918 = vst [vmem:[#allocation24_spill] sm:$0xff] %v2600_v3  ;;  %1174 = vadd.xlane.f32.xlu0 %v1173_v43  ;;  %v1176_v0 = vadd.f32 %v2600_v3, %v2596_v25 }
 0x344   : > { %1177 = vadd.xlane.f32.xlu1 %v1176_v0 }
 0x377   : > { %v1109_v56 = vpop.xlane.xlu0 %1108 }
 0x378   : > { %1820 = vrcp.f32 %v1109_v56 }
 0x37a   : > { %v1112_v39 = vpop.xlane.xlu1 %1111 }
 0x37b   : > { %1822 = vrcp.f32 %v1112_v39  ;;  %v893_v53 = vpop.xlane.xlu0 %892 }
 0x37c   : > { %v963_v23 = vsub.f32 %v2335_v22, %v893_v53  ;;  %v964_v12 = vsub.f32 %v2337_v26, %v893_v53 }
 0x37e   : > { %v1075_v37 = vmul.f32 1.442695, %v963_v23  ;;  %v1077_v18 = vmul.f32 1.442695, %v964_v12  ;;  %v896_v38 = vpop.xlane.xlu1 %895 }
 0x37f   : > { %v965_v62 = vsub.f32 %v2339_v28, %v896_v38  ;;  %v966_v43 = vsub.f32 %v2343_v34, %v896_v38  ;;  %v1115_v33 = vpop.xlane.xlu0 %1114 }
 0x380   : > { %1824 = vpow2.f32 %v1075_v37 }
 0x381   : > { %1826 = vpow2.f32 %v1077_v18  ;;  %v1079_v0 = vmul.f32 1.442695, %v965_v62  ;;  %v1081_v25 = vmul.f32 1.442695, %v966_v43 }
 0x382   : > { %v1821_v56 = vpop.eup %1820  ;;  %1828 = vrcp.f32 %v1115_v33  ;;  %v1118_v39 = vpop.xlane.xlu1 %1117 }
 0x383   : > { %1830 = vpow2.f32 %v1079_v0  ;;  %v899_v3 = vpop.xlane.xlu0 %898  ;;  %v1236_v28 = vmul.f32 %v1821_v56, %v2398_v47  ;;  %v1235_v34 = vmul.f32 %v1821_v56, %v2396_v48 }
 0x384   : > { %1832 = vpow2.f32 %v1081_v25  ;;  %v967_v22 = vsub.f32 %v2347_v40, %v899_v3  ;;  %v968_v26 = vsub.f32 %v2349_v44, %v899_v3 }
 0x385   : > { %v1823_v53 = vpop.eup %1822  ;;  %1834 = vrcp.f32 %v1118_v39 }
 0x386   : > { %v1083_v37 = vmul.f32 1.442695, %v967_v22  ;;  %v1085_v18 = vmul.f32 1.442695, %v968_v26  ;;  %v902_v38 = vpop.xlane.xlu1 %901  ;;  %v1238_v62 = vmul.f32 %v1823_v53, %v2406_v2  ;;  %v1237_v33 = vmul.f32 %v1823_v53, %v2400_v49 }
 0x387   : > { %v969_v23 = vsub.f32 %v2351_v46, %v902_v38  ;;  %v970_v25 = vsub.f32 %v2355_v52, %v902_v38  ;;  %v1121_v40 = vpop.xlane.xlu0 %1120 }
 0x388   : > { %1836 = vpow2.f32 %v1083_v37  ;;  %v1300_v44 = vpack.c.bf16 %v1238_v62, %v1236_v28  ;;  %v1299_v3 = vpack.c.bf16 %v1237_v33, %v1235_v34 }
 0x389   : > { %1838 = vpow2.f32 %v1085_v18  ;;  %v1087_v12 = vmul.f32 1.442695, %v969_v23  ;;  %v1089_v47 = vmul.f32 1.442695, %v970_v25 }
 0x38a   : > { %v2616_v43 = vpop.eup %1824  ;;  %1840 = vrcp.f32 %v1121_v40  ;;  %1331 = vmatprep.subr.bf16.mxu0 %v1300_v44  ;;  %v1124_v48 = vpop.xlane.xlu1 %1123 }
 0x38b   : > { %v2618_v0 = vpop.eup %1826  ;;  %1842 = vpow2.f32 %v1087_v12  ;;  %1332 = vmatpush1.bf16.xpose.msra.mxu0 %v1299_v3  ;;  %v905_v49 = vpop.xlane.xlu0 %904 }
 0x38c   : > { %v1829_v46 = vpop.eup %1828  ;;  %1844 = vpow2.f32 %v1089_v47  ;;  %v971_v52 = vsub.f32 %v2359_v1, %v905_v49  ;;  %v972_v2 = vsub.f32 %v2361_v14, %v905_v49  ;;  %v1179_v56 = vadd.f32 %v2618_v0, %v2616_v43 }
 0x38d   : > { %v2624_v39 = vpop.eup %1830  ;;  %1846 = vrcp.f32 %v1124_v48  ;;  %v1240_v38 = vmul.f32 %v1829_v46, %v2417_v55  ;;  %v1239_v33 = vmul.f32 %v1829_v46, %v2412_v6 }
 0x38e   : > { %v2626_v22 = vpop.eup %1832  ;;  %v1091_v26 = vmul.f32 1.442695, %v971_v52  ;;  %v1093_v53 = vmul.f32 1.442695, %v972_v2  ;;  %1180 = vadd.xlane.f32.xlu0 %v1179_v56  ;;  %v908_v28 = vpop.xlane.xlu1 %907 }
 0x38f   : > { %v1835_v34 = vpop.eup %1834  ;;  %v973_v37 = vsub.f32 %v2363_v20, %v908_v28  ;;  %v974_v18 = vsub.f32 %v2367_v32, %v908_v28  ;;  %v1127_v1 = vpop.xlane.xlu0 %1126  ;;  %v1182_v14 = vadd.f32 %v2626_v22, %v2624_v39 }
 0x390   : > { %1848 = vpow2.f32 %v1091_v26  ;;  %v1242_v62 = vmul.f32 %v1835_v34, %v2425_v51  ;;  %v1241_v23 = vmul.f32 %v1835_v34, %v2419_v9 }
 0x391   : > { %1850 = vpow2.f32 %v1093_v53  ;;  %v1095_v25 = vmul.f32 1.442695, %v973_v37  ;;  %v1097_v40 = vmul.f32 1.442695, %v974_v18  ;;  %1183 = vadd.xlane.f32.xlu1 %v1182_v14 }
 0x392   : > { %v2636_v20 = vpop.eup %1836  ;;  %1852 = vrcp.f32 %v1127_v1  ;;  %v1302_v32 = vpack.c.bf16 %v1242_v62, %v1240_v38  ;;  %v1130_v44 = vpop.xlane.xlu1 %1129  ;;  %v1301_v3 = vpack.c.bf16 %v1241_v23, %v1239_v33 }
 0x393   : > { %v2638_v12 = vpop.eup %1838  ;;  %1854 = vpow2.f32 %v1095_v25  ;;  %v911_v55 = vpop.xlane.xlu0 %910 }
 0x394   : > { %v1841_v47 = vpop.eup %1840  ;;  %1856 = vpow2.f32 %v1097_v40  ;;  %1333 = vmatprep.subr.bf16.mxu0 %v1302_v32  ;;  %v975_v6 = vsub.f32 %v2371_v5, %v911_v55  ;;  %v976_v9 = vsub.f32 %v2373_v16, %v911_v55  ;;  %v1185_v51 = vadd.f32 %v2638_v12, %v2636_v20 }
 0x395   : > { %v2644_v48 = vpop.eup %1842  ;;  %1858 = vrcp.f32 %v1130_v44  ;;  %1334 = vmatpush1.bf16.xpose.msra.mxu0 %v1301_v3  ;;  %v1244_v28 = vmul.f32 %v1841_v47, %v2439_v50  ;;  %v1243_v37 = vmul.f32 %v1841_v47, %v2434_v10 }
 0x396   : > { %v2646_v49 = vpop.eup %1844  ;;  %v1099_v46 = vmul.f32 1.442695, %v975_v6  ;;  %v1101_v52 = vmul.f32 1.442695, %v976_v9  ;;  %1186 = vadd.xlane.f32.xlu0 %v1185_v51  ;;  %v914_v2 = vpop.xlane.xlu1 %913 }
 0x397   : > { %v1847_v56 = vpop.eup %1846  ;;  %v977_v26 = vsub.f32 %v2375_v59, %v914_v2  ;;  %v978_v5 = vsub.f32 %v2379_v8, %v914_v2  ;;  %v1133_v53 = vpop.xlane.xlu0 %1132  ;;  %v1188_v16 = vadd.f32 %v2646_v49, %v2644_v48 }
 0x398   : > { %1860 = vpow2.f32 %v1099_v46  ;;  %v1246_v34 = vmul.f32 %v1847_v56, %v2447_v7  ;;  %v1245_v18 = vmul.f32 %v1847_v56, %v2441_v15 }
 0x399   : > { %1862 = vpow2.f32 %v1101_v52  ;;  %v1103_v1 = vmul.f32 1.442695, %v977_v26  ;;  %v1105_v14 = vmul.f32 1.442695, %v978_v5  ;;  %1189 = vadd.xlane.f32.xlu1 %v1188_v16 }
 0x39a   : > { %v2656_v59 = vpop.eup %1848  ;;  %1864 = vrcp.f32 %v1133_v53  ;;  %v1304_v8 = vpack.c.bf16 %v1246_v34, %v1244_v28  ;;  %v1136_v38 = vpop.xlane.xlu1 %1135  ;;  %v1303_v62 = vpack.c.bf16 %v1245_v18, %v1243_v37 }
 0x39b   : > { %v2658_v33 = vpop.eup %1850  ;;  %1866 = vpow2.f32 %v1103_v1 }
 0x39c   : > { %v1853_v50 = vpop.eup %1852  ;;  %1868 = vpow2.f32 %v1105_v14  ;;  %1335 = vmatprep.subr.bf16.mxu0 %v1304_v8  ;;  %v1191_v10 = vadd.f32 %v2658_v33, %v2656_v59 }
 0x39d   : > { %v2662_v15 = vpop.eup %1854  ;;  %1870 = vrcp.f32 %v1136_v38  ;;  %1336 = vmatpush1.bf16.xpose.msra.mxu0 %v1303_v62  ;;  %v1248_v32 = vmul.f32 %v1853_v50, %v2461_v11  ;;  %v1247_v3 = vmul.f32 %v1853_v50, %v2456_v45 }
 0x39e   : > { %v2664_v7 = vpop.eup %1856  ;;  %1192 = vadd.xlane.f32.xlu0 %v1191_v10 }
 0x39f   : > { %v1859_v23 = vpop.eup %1858  ;;  %v1139_v25 = vpop.xlane.xlu0 %1138  ;;  %v1194_v40 = vadd.f32 %v2664_v7, %v2662_v15 }
 0x3a0   : > { %v1250_v44 = vmul.f32 %v1859_v23, %v2469_v13  ;;  %v1249_v55 = vmul.f32 %v1859_v23, %v2463_v21  ;;  %1872 = vrcp.f32 %v1139_v25 }
 0x3a1   : > { %1195 = vadd.xlane.f32.xlu1 %v1194_v40 }
 0x3a2   : > { %v2672_v47 = vpop.eup %1860  ;;  %v1306_v6 = vpack.c.bf16 %v1250_v44, %v1248_v32  ;;  %v1142_v9 = vpop.xlane.xlu1 %1141  ;;  %v1305_v51 = vpack.c.bf16 %v1249_v55, %v1247_v3 }
 0x3a3   : > { %v2674_v46 = vpop.eup %1862  ;;  %1874 = vrcp.f32 %v1142_v9  ;;  %v2920_v9 = vld [vmem:[#allocation25_spill] sm:$0xff] }
 0x3a4   : > { %v1865_v52 = vpop.eup %1864  ;;  %1337 = vmatprep.subr.bf16.mxu0 %v1306_v6  ;;  %v1197_v11 = vadd.f32 %v2674_v46, %v2672_v47  ;;  %v2919_v6 = vld [vmem:[#allocation13_spill] sm:$0xff] }
 0x3a5   : > { %v2678_v13 = vpop.eup %1866  ;;  %1338 = vmatpush1.bf16.xpose.msra.mxu0 %v1305_v51  ;;  %v1252_v26 = vmul.f32 %v1865_v52, %v2483_v17  ;;  %v1251_v53 = vmul.f32 %v1865_v52, %v2478_v63 }
 0x3a6   : > { %v2680_v45 = vpop.eup %1868  ;;  %1198 = vadd.xlane.f32.xlu0 %v1197_v11  ;;  %v2700_v11 = vpop.f32.mrb[8].mxu0 }
 0x3a7   : > { %v1871_v21 = vpop.eup %1870  ;;  %v1145_v2 = vpop.xlane.xlu0 %1144  ;;  %v1200_v56 = vadd.f32 %v2680_v45, %v2678_v13 }
 0x3a8   : > { %v1254_v5 = vmul.f32 %v1871_v21, %v2491_v19  ;;  %v1253_v16 = vmul.f32 %v1871_v21, %v2485_v27  ;;  %1876 = vrcp.f32 %v1145_v2  ;;  %v441_v21 = vpop.f32.mrb[9].mxu0 }
 0x3a9   : > { %1201 = vadd.xlane.f32.xlu1 %v1200_v56  ;;  %v2702_v56 = vpop.f32.mrb[10].mxu0 }
 0x3aa   : > { %v1308_v28 = vpack.c.bf16 %v1254_v5, %v1252_v26  ;;  %v1148_v34 = vpop.xlane.xlu1 %1147  ;;  %v1307_v37 = vpack.c.bf16 %v1253_v16, %v1251_v53  ;;  %v1873_v18 = vpop.eup %1872  ;;  %v2922_v16 = vld [vmem:[#allocation15_spill] sm:$0xff] }
 0x3ab   : > { %1878 = vrcp.f32 %v1148_v34  ;;  %v1256_v14 = vmul.f32 %v1873_v18, %v2502_v60  ;;  %v1255_v63 = vmul.f32 %v1873_v18, %v2500_v58  ;;  %v2923_v34 = vld [vmem:[#allocation17_spill] sm:$0xff]  ;;  %v2924_v18 = vld [vmem:[#allocation16_spill] sm:$0xff] }
 0x3ac   : > { %1339 = vmatprep.subr.bf16.mxu0 %v1308_v28 }
 0x3ad   : > { %v1875_v1 = vpop.eup %1874  ;;  %1340 = vmatpush1.bf16.xpose.msra.mxu0 %v1307_v37 }
 0x3ae   : > { %v1258_v17 = vmul.f32 %v1875_v1, %v2510_v54  ;;  %v1257_v19 = vmul.f32 %v1875_v1, %v2504_v24 }
 0x3af   : > { %v1151_v8 = vpop.xlane.xlu0 %1150 }
 0x3b0   : > { %v1310_v27 = vpack.c.bf16 %v1258_v17, %v1256_v14  ;;  %1880 = vrcp.f32 %v1151_v8  ;;  %v1309_v38 = vpack.c.bf16 %v1257_v19, %v1255_v63  ;;  %v445_v14 = vpop.f32.mrb[11].mxu0  ;;  %v2925_v19 = vld [vmem:[#allocation14_spill] sm:$0xff] }
 0x3b1   : > { %v538_v63 = vpack.c.bf16 %v445_v14, %v441_v21 }
 0x3b2   : > { %1341 = vmatprep.subr.bf16.mxu0 %v1310_v27  ;;  %v1154_v62 = vpop.xlane.xlu1 %1153  ;;  %v1877_v50 = vpop.eup %1876 }
 0x3b3   : > { %1882 = vrcp.f32 %v1154_v62  ;;  %v1260_v23 = vmul.f32 %v1877_v50, %v2518_v4  ;;  %v1259_v24 = vmul.f32 %v1877_v50, %v2516_v36  ;;  %v2710_v27 = vpop.f32.mrb[12].mxu0  ;;  %1363 = vmatprep.mubr.bf16.mxu0 %v538_v63 }
 0x3b4   : > { %v2712_v62 = vpop.f32.mrb[13].mxu0 }
 0x3b5   : > { %v1879_v10 = vpop.eup %1878  ;;  %1342 = vmatpush1.bf16.xpose.msra.mxu0 %v1309_v38 }
 0x3b6   : > { %v1262_v60 = vmul.f32 %v1879_v10, %v2526_v30  ;;  %v1261_v54 = vmul.f32 %v1879_v10, %v2520_v57  ;;  %v2921_v57 = vld [vmem:[#allocation12_spill] sm:$0xff] }
 0x3b7   : > { %v1157_v25 = vpop.xlane.xlu0 %1156 }
 0x3b8   : > { %v1312_v40 = vpack.c.bf16 %v1262_v60, %v1260_v23  ;;  %1884 = vrcp.f32 %v1157_v25  ;;  %v1311_v58 = vpack.c.bf16 %v1261_v54, %v1259_v24  ;;  %v2714_v23 = vpop.f32.mrb[14].mxu0 }
 0x3b9   : > { %v539_v60 = vpack.c.bf16 %v2714_v23, %v2710_v27  ;;  %v1386_v27 = vld [vmem:[%s2132_s23] sm:$0xf] }
 0x3ba   : > { %1343 = vmatprep.subr.bf16.mxu0 %v1312_v40  ;;  %v1160_v32 = vpop.xlane.xlu1 %1159  ;;  %v1881_v44 = vpop.eup %1880  ;;  %v1384_v23 = vld [vmem:[#allocation2] sm:$0xff] }
 0x3bb   : > { %1886 = vrcp.f32 %v1160_v32  ;;  %v1264_v55 = vmul.f32 %v1881_v44, %v2534_v61  ;;  %v1263_v52 = vmul.f32 %v1881_v44, %v2921_v57  ;;  %v537_v61 = vpack.c.bf16 %v2702_v56, %v2700_v11  ;;  %v2721_v32 = vpop.f32.mrb[15].mxu0  ;;  %v2927_v57 = vld [vmem:[#allocation19_spill] sm:$0xff] }
 0x3bd   : > { %v1883_v3 = vpop.eup %1882  ;;  %1344 = vmatpush1.bf16.xpose.msra.mxu0 %v1311_v58 }
 0x3be   : > { %v1266_v4 = vmul.f32 %v1883_v3, %v2919_v6  ;;  %v1265_v30 = vmul.f32 %v1883_v3, %v2920_v9 }
 0x3bf   : > { %v1163_v51 = vpop.xlane.xlu0 %1162 }
 0x3c0   : > { %v1314_v36 = vpack.c.bf16 %v1266_v4, %v1264_v55  ;;  %1888 = vrcp.f32 %v1163_v51  ;;  %v1313_v2 = vpack.c.bf16 %v1265_v30, %v1263_v52  ;;  %v540_v55 = vpack.c.bf16 %v2721_v32, %v2712_v62 }
 0x3c2   : > { %1345 = vmatprep.subr.bf16.mxu0 %v1314_v36  ;;  %v1166_v26 = vpop.xlane.xlu1 %1165  ;;  %v1885_v5 = vpop.eup %1884 }
 0x3c3   : > { %1890 = vrcp.f32 %v1166_v26  ;;  %v1268_v28 = vmul.f32 %v1885_v5, %v2922_v16  ;;  %v1267_v8 = vmul.f32 %v1885_v5, %v2925_v19 }
 0x3c5   : > { %v1887_v53 = vpop.eup %1886  ;;  %1346 = vmatpush1.bf16.xpose.msra.mxu0 %v1313_v2 }
 0x3c6   : > { %v1270_v37 = vmul.f32 %v1887_v53, %v2923_v34  ;;  %v1269_v1 = vmul.f32 %v1887_v53, %v2924_v18  ;;  %v2929_v53 = vld [vmem:[#allocation22_spill] sm:$0xff] }
 0x3c7   : > { %v1169_v17 = vpop.xlane.xlu0 %1168 }
 0x3c8   : > { %1892 = vrcp.f32 %v1169_v17  ;;  %v1316_v38 = vpack.c.bf16 %v1270_v37, %v1268_v28  ;;  %v1315_v10 = vpack.c.bf16 %v1269_v1, %v1267_v8  ;;  %v2930_v28 = vld [vmem:[#allocation24_spill] sm:$0xff]  ;;  %v2931_v37 = vld [vmem:[#allocation23_spill] sm:$0xff] }
 0x3c9   : > { %v1172_v50 = vpop.xlane.xlu1 %1171 }
 0x3ca   : > { %1347 = vmatprep.subr.bf16.mxu0 %v1316_v38  ;;  %1894 = vrcp.f32 %v1172_v50  ;;  %v1889_v54 = vpop.eup %1888 }
 0x3cb   : > { %v1272_v24 = vmul.f32 %v1889_v54, %v2566_v29  ;;  %v1271_v3 = vmul.f32 %v1889_v54, %v2564_v35  ;;  %v2928_v35 = vld [vmem:[#allocation18_spill] sm:$0xff] }
 0x3cd   : > { %v1891_v25 = vpop.eup %1890  ;;  %1348 = vmatpush1.bf16.xpose.msra.mxu0 %v1315_v10 }
 0x3ce   : > { %v1274_v40 = vmul.f32 %v1891_v25, %v2574_v41  ;;  %v1273_v58 = vmul.f32 %v1891_v25, %v2568_v31  ;;  %v2926_v31 = vld [vmem:[#allocation20_spill] sm:$0xff] }
 0x3cf   : > { %v1175_v44 = vpop.xlane.xlu0 %1174 }
 0x3d0   : > { %1896 = vrcp.f32 %v1175_v44  ;;  %v1318_v6 = vpack.c.bf16 %v1274_v40, %v1272_v24  ;;  %v1317_v9 = vpack.c.bf16 %v1273_v58, %v1271_v3 }
 0x3d1   : > { %v1178_v4 = vpop.xlane.xlu1 %1177 }
 0x3d2   : > { %v1893_v30 = vpop.eup %1892  ;;  %1349 = vmatprep.subr.bf16.mxu0 %v1318_v6  ;;  %1898 = vrcp.f32 %v1178_v4 }
 0x3d3   : > { %v1276_v41 = vmul.f32 %v1893_v30, %v2582_v42  ;;  %v1275_v21 = vmul.f32 %v1893_v30, %v2928_v35  ;;  %v2932_v42 = vld [vmem:[#allocation21_spill] sm:$0xff] }
 0x3d4   : > { %v1895_v29 = vpop.eup %1894 }
 0x3d5   : > { %1350 = vmatpush1.bf16.xpose.msra.mxu0 %v1317_v9  ;;  %v1278_v51 = vmul.f32 %v1895_v29, %v2926_v31  ;;  %v1277_v52 = vmul.f32 %v1895_v29, %v2927_v57 }
 0x3d7   : > { %v1320_v36 = vpack.c.bf16 %v1278_v51, %v1276_v41  ;;  %v1319_v2 = vpack.c.bf16 %v1277_v52, %v1275_v21 }
 0x3d9   : > { %1351 = vmatprep.subr.bf16.mxu0 %v1320_v36 }
 0x3da   : > { %v1897_v26 = vpop.eup %1896 }
 0x3db   : > { %v1280_v16 = vmul.f32 %v1897_v26, %v2929_v53  ;;  %v1279_v14 = vmul.f32 %v1897_v26, %v2932_v42 }
 0x3dc   : > { %v1899_v5 = vpop.eup %1898 }
 0x3dd   : > { %1352 = vmatpush1.bf16.xpose.msra.mxu0 %v1319_v2  ;;  %v1282_v34 = vmul.f32 %v1899_v5, %v2930_v28  ;;  %v1281_v18 = vmul.f32 %v1899_v5, %v2931_v37 }
 0x3df   : > { %v1322_v1 = vpack.c.bf16 %v1282_v34, %v1280_v16  ;;  %v1321_v17 = vpack.c.bf16 %v1281_v18, %v1279_v14  ;;  %v1445_v14 = vld [vmem:[%s2826_s4] sm:$0xff] (!%p1634_p1) }
 0x3e1   : > { %1353 = vmatprep.subr.bf16.mxu0 %v1322_v1 }
 0x3e5   : > { %1354 = vmatpush1.bf16.xpose.msra.mxu0 %v1321_v17  ;;  %v2015_v17 = vmov (!%p1634_p1), 0  }
 0x3e6   : > { %1916 = vset.pattern.permute.xlu0 (!%p1634_p1), %v2015_v17 }
 0x3e7   : > { %1448 = vperm.xlu0 (!%p1634_p1), %1916, %v1445_v14  }
 0x41b   : > { %v1181_v19 = vpop.xlane.xlu0 %1180 }
 0x41c   : > { %1900 = vrcp.f32 %v1181_v19 }
 0x41e   : > { %v1184_v8 = vpop.xlane.xlu1 %1183 }
 0x41f   : > { %1902 = vrcp.f32 %v1184_v8 }
 0x423   : > { %v1187_v63 = vpop.xlane.xlu0 %1186 }
 0x424   : > { %1904 = vrcp.f32 %v1187_v63 }
 0x426   : > { %v1190_v38 = vpop.xlane.xlu1 %1189  ;;  %v1901_v50 = vpop.eup %1900 }
 0x427   : > { %1906 = vrcp.f32 %v1190_v38  ;;  %v1284_v54 = vmul.f32 %v1901_v50, %v2618_v0  ;;  %v1283_v24 = vmul.f32 %v1901_v50, %v2616_v43 }
 0x429   : > { %v1903_v10 = vpop.eup %1902 }
 0x42a   : > { %v1286_v25 = vmul.f32 %v1903_v10, %v2626_v22  ;;  %v1285_v40 = vmul.f32 %v1903_v10, %v2624_v39 }
 0x42b   : > { %v1193_v58 = vpop.xlane.xlu0 %1192 }
 0x42c   : > { %v1324_v44 = vpack.c.bf16 %v1286_v25, %v1284_v54  ;;  %v1323_v3 = vpack.c.bf16 %v1285_v40, %v1283_v24  ;;  %1908 = vrcp.f32 %v1193_v58 }
 0x42e   : > { %1355 = vmatprep.subr.bf16.mxu0 %v1324_v44  ;;  %v1196_v6 = vpop.xlane.xlu1 %1195  ;;  %v1905_v4 = vpop.eup %1904 }
 0x42f   : > { %1910 = vrcp.f32 %v1196_v6  ;;  %1356 = vmatpush1.bf16.xpose.msra.mxu0 %v1323_v3  ;;  %v1288_v30 = vmul.f32 %v1905_v4, %v2638_v12  ;;  %v1287_v22 = vmul.f32 %v1905_v4, %v2636_v20 }
 0x431   : > { %v1907_v9 = vpop.eup %1906 }
 0x432   : > { %v1290_v0 = vmul.f32 %v1907_v9, %v2646_v49  ;;  %v1289_v43 = vmul.f32 %v1907_v9, %v2644_v48 }
 0x433   : > { %v1199_v29 = vpop.xlane.xlu0 %1198 }
 0x434   : > { %v1326_v39 = vpack.c.bf16 %v1290_v0, %v1288_v30  ;;  %v1325_v41 = vpack.c.bf16 %v1289_v43, %v1287_v22  ;;  %1912 = vrcp.f32 %v1199_v29 }
 0x436   : > { %1357 = vmatprep.subr.bf16.mxu0 %v1326_v39  ;;  %v1202_v31 = vpop.xlane.xlu1 %1201  ;;  %v1909_v51 = vpop.eup %1908 }
 0x437   : > { %1914 = vrcp.f32 %v1202_v31  ;;  %1358 = vmatpush1.bf16.xpose.msra.mxu0 %v1325_v41  ;;  %v1292_v52 = vmul.f32 %v1909_v51, %v2658_v33  ;;  %v1291_v49 = vmul.f32 %v1909_v51, %v2656_v59  ;;  %v2933_v59 = vmov 0  }
 0x439   : > { %v1911_v57 = vpop.eup %1910 }
 0x43a   : > { %v1294_v12 = vmul.f32 %v1911_v57, %v2664_v7  ;;  %v1293_v20 = vmul.f32 %v1911_v57, %v2662_v15 }
 0x43c   : > { %v1328_v36 = vpack.c.bf16 %v1294_v12, %v1292_v52  ;;  %v1327_v48 = vpack.c.bf16 %v1293_v20, %v1291_v49 }
 0x43e   : > { %1359 = vmatprep.subr.bf16.mxu0 %v1328_v36  ;;  %v1913_v35 = vpop.eup %1912 }
 0x43f   : > { %1360 = vmatpush1.bf16.xpose.msra.mxu0 %v1327_v48  ;;  %v1296_v2 = vmul.f32 %v1913_v35, %v2674_v46  ;;  %v1295_v5 = vmul.f32 %v1913_v35, %v2672_v47 }
 0x441   : > { %v1915_v21 = vpop.eup %1914 }
 0x442   : > { %v1298_v26 = vmul.f32 %v1915_v21, %v2680_v45  ;;  %v1297_v33 = vmul.f32 %v1915_v21, %v2678_v13 }
 0x444   : > { %v1330_v53 = vpack.c.bf16 %v1298_v26, %v1296_v2  ;;  %v1329_v7 = vpack.c.bf16 %v1297_v33, %v1295_v5 }
 0x446   : > { %1361 = vmatprep.subr.bf16.mxu0 %v1330_v53 }
 0x447   : > { %1362 = vmatpush1.bf16.xpose.msra.mxu0 %v1329_v7 }
 0x44e   : > { %1364 = vmatmul.mubr.bf16.vlgmr.msra.gmra.mrb[16].mxu0 %v537_v61 }
 0x44f   : > { %1373 = vmatprep.mubr.bf16.mxu0 %v540_v55 }
 0x456   : > { %1374 = vmatmul.mubr.bf16.gmra.mrb[20].mxu0 %v539_v60  ;;  %v1385_v60 = vld [vmem:[#allocation2 + $0x8] sm:$0xff] }
 0x457   : > { %1426 = vmatprep.mubr.bf16.mxu0 %v2933_v59 }
 0x466   : > { %v1449_v63 = vpop.permute.xlu0 (!%p1634_p1), %1448 }
 0x521   : > { %v1365_v15 = vpop.f32.mrb[16].mxu0 }
 0x522   : > { %v1367_v47 = vpop.f32.mrb[17].mxu0 }
 0x523   : > { %v1369_v46 = vpop.f32.mrb[18].mxu0 }
 0x524   : > { %v1387_v13 = vpack.c.bf16 %v1369_v46, %v1365_v15  ;;  %v1371_v45 = vpop.f32.mrb[19].mxu0 }
 0x525   : > { %v1388_v16 = vpack.c.bf16 %v1371_v45, %v1367_v47 }
 0x527   : > { %1394 = vmatprep.subr.bf16.mxu0 %v1388_v16 }
 0x528   : > { %1395 = vmatpush1.bf16.msra.mxu0 %v1387_v13 }
 0x529   : > { %v1375_v11 = vpop.f32.mrb[20].mxu0 }
 0x52a   : > { %v1377_v56 = vpop.f32.mrb[21].mxu0 }
 0x52b   : > { %v1379_v61 = vpop.f32.mrb[22].mxu0 }
 0x52c   : > { %v1389_v62 = vpack.c.bf16 %v1379_v61, %v1375_v11  ;;  %v1381_v32 = vpop.f32.mrb[23].mxu0 }
 0x52d   : > { %v1390_v55 = vpack.c.bf16 %v1381_v32, %v1377_v56 }
 0x52f   : > { %1396 = vmatprep.subr.bf16.mxu0 %v1390_v55 }
 0x530   : > { %1397 = vmatpush1.bf16.msra.mxu0 %v1389_v62 }
 0x533   : > { %1633 = vmatmul.mubr.msk.bf16.vlgmr.msra.gmra.mrb[24].mxu0 %vm577_vm2, %v1386_v27 }
 0x604   : > { %1442 = sbr.rel (%p1634_p1) target bundleno = 1557 (0x615), region = 48 }
 0x606   : > { %v1428_v28 = vpop.f32.mrb[24].mxu0 }
 0x607   : > { %v1435_v34 = vadd.f32 %v1428_v28, %v1384_v23  ;;  %v1430_v37 = vpop.f32.mrb[25].mxu0 }
 0x608   : > { %v1436_v18 = vadd.f32 %v1430_v37, %v1385_v60  ;;  %v1432_v1 = vpop.f32.mrb[26].mxu0 }
 0x609   : > { %1437 = vst [vmem:[#allocation2] sm:$0xff] %v1435_v34  ;;  %v1433_v42 = vpop.f32.mrb[27].mxu0 }
 0x60a   : > { %1438 = vst [vmem:[#allocation2 + $0x8] sm:$0xff] %v1436_v18 }
 0x610   : > { %v1443_v19 = vld [vmem:[#allocation2] sm:$0xff] }
 0x611   : > { %v1444_v8 = vld [vmem:[#allocation2 + $0x8] sm:$0xff]  ;;  %v1451_v38 = vadd.f32 %v1449_v63, %v1443_v19 }
 0x612   : > { %v1452_v50 = vadd.f32 %v1449_v63, %v1444_v8 }
 0x613   : > { %1453 = vst [vmem:[%s2139_s12] sm:$0xff] %v1451_v38 }
 0x614   : > { %1454 = vst [vmem:[%s2139_s12 + $0x8] sm:$0xff] %v1452_v50 }
 0x615 PF: > { %s1642_s21 = sshll.u32 %s1999_s22, 8  ;;  %s1472_s9 = sshll.u32 %s2139_s12, 4  ;;  %s1473_s9 = int_to_ptr.vmem [resolvable:$true] %s1472_s9 }
 0x616   : > { %s2772_s29 = scalar_lea.hbm %s2827_s5, %s1642_s21  ;;  %s2934_s10 = sand.u32 1, %s1987_s19  }
 0x617   : > { %s1456_s11 = scalar_lea.sflag [#allocation4], %s2934_s10  ;;  %s1917_s13 = scalar_lea.vmem %s1473_s9, 256 }
 0x618   : > { %p1918_p2 = scmp.ne.s32.totalorder %s1473_s9, %s1917_s13  ;;  %s2016_s14 = smov [#allocation3]  }
 0x619   : > { %s1921_s15 = sshll.u32 %s2016_s14, 4  ;;  %s1922_s15 = int_to_ptr.vmem [resolvable:$false] %s1921_s15 }
 0x61a   : > { %p1919_p4 = pnand %p1918_p2, %p2096_p3  ;;  %s1923_s16 = scalar_lea.vmem %s1922_s15, 512 }
 0x61b   : > { %p1924_p6 = scmp.lt.s32.totalorder %s1473_s9, %s1922_s15  ;;  %p1925_p7 = scmp.lt.s32.totalorder %s1923_s16, %s1917_s13 }
 0x61c   : > { %p1920_p5 = pneg %p1919_p4 }
 0x61d   : > { %p1926_p8 = por %p1925_p7, %p1924_p6 }
 0x61f   : > { %p1927_p10 = pnand %p1926_p8, %p1920_p5 }
 0x621   : > { %1930 = shalt.err (!%p1927_p10)
}
 0x622   : > { %s1931_s22 = scalar_lea.hbm %s2772_s29, 256  ;;  %s1935_s27 = scalar_lea.hbm %s2827_s5, 512 }
 0x623   : > { %p1932_p11 = scmp.ne.s32.totalorder %s2772_s29, %s1931_s22  ;;  %p1936_p0 = scmp.lt.u32.totalorder %s2772_s29, %s2827_s5 }
 0x624   : > { %p1937_p1 = scmp.lt.u32.totalorder %s1935_s27, %s1931_s22  ;;  %p1939_p4 = scmp.lt.u32.totalorder %s1931_s22, %s2772_s29 }
 0x625   : > { %p1933_p12 = pnand %p1932_p11, %p2096_p3 }
 0x626   : > { %p1938_p2 = por %p1937_p1, %p1936_p0 }
 0x627   : > { %p1934_p13 = pneg %p1933_p12 }
 0x628   : > { %p1940_p5 = por %p1939_p4, %p1938_p2 }
 0x62a   : > { %p1941_p6 = pnand %p1940_p5, %p1934_p13 }
 0x62c   : > { %1944 = shalt.err (!%p1941_p6)
}
 0x62d   : > { %1644 = dma.vmem_to_hbm [thread:$0]  (%p2096_p3), %s1473_s9, 256, %s2772_s29, %s1456_s11  }
 0x62e PF: > { %p1650_p7 = scmp.ge.s32.totalorder %s2011_s25, 2  ;;  %s1484_s12 = sand.u32 1, %s1983_s18  }
 0x62f   : > { %s1485_s20 = scalar_lea.sflag [#allocation4], %s1484_s12 }
 0x630   : > { %p1647_p8 = pnand %p1650_p7, %p2106_p9 }
 0x632   : > { %1978 = dma.done.wait (!%p1647_p8), %s1485_s20, 256  }
 0x633   : > { %1980 = vsyncadd (!%p1647_p8), %s1485_s20, 4294967040  ;;  %s18_s25 = sadd.s32 1, %s2011_s25   ;;  %s2935_s24 = sld [smem:[#allocation6_spill]] }
 0x634   : > { %p15_p10 = scmp.ge.s32.totalorder %s18_s25, 10   ;;  %s2936_s20 = sld [smem:[#allocation11_spill]] }
 0x635   : > { %s2937_s21 = sld [smem:[#allocation7_spill]]  ;;  %s2938_s22 = sld [smem:[#allocation8_spill]] }
 0x636   : > { %s2939_s23 = sld [smem:[#allocation9_spill]]  ;;  %s2940_s30 = sld [smem:[#allocation10_spill]] }
 0x637   : > { %s2941_s18 = smov %s1987_s19  ;;  %17 = sbr.rel (!%p15_p10) target bundleno = 5 (0x5), region = 92 }
 0x639   : > { %s2942_s19 = smov %s2935_s24 }
 0x63c   : > { %s2943_s24 = smov %s2940_s30 }
 0x63e   :  { %1490 = vsyncpa [#allocation4], 1 }
 0x63f   :  { %1492 = vsyncpa [#allocation4 + $0x1], 1 }

</bundles_post_ra>
